<compile_context>
chip_gen: v7x
topology: tpu7x:2x2x1
jax: 0.10.0
libtpu: 0.0.40
codegen_flags: <defaults>
</compile_context>

<pallas_src>
import functools

import jax
import jax.numpy as jnp
from jax.experimental import pallas as pl
from jax.experimental.pallas import tpu as pltpu  # noqa: F401  (CompilerParams if scaled up)

# ---------------- synthetic CLIP-ViT config (small) ----------------
PATCH = 16
IMG = 32
CHANNELS = 3
HIDDEN = 32                    # vis_dim
HEADS = 2
HEAD_DIM = HIDDEN // HEADS
MLP_DIM = 4 * HIDDEN
LAYERS = 2
NUM_CLASSES = 6
CLS_HIDDEN = 512               # classifier hidden from the nn.Module
LN_EPS = 1e-5
SEQ = (IMG // PATCH) ** 2 + 1  # patches + CLS


# ---------------- fully fused forward kernel ----------------
def _clip_forward_kernel(
    patches_ref,            # [TOK, C*P*P] bf16 (row 0 of each crop is all-zero -> CLS slot)
    pos_ref,                # [TOK, H] f32  (class_emb folded into the CLS rows)
    attn_bias_ref,          # [HEADS*TOK, HEADS*TOK] f32 additive mask (0 / -1e30)
    sel_ref,                # [B, TOK] bf16 CLS-selection + crop-mean matrix
    patch_w_ref,            # [C*P*P, H] bf16
    pre_g_ref, pre_b_ref,   # [1, H] f32
    ln1_g_ref, ln1_b_ref,   # [L, 1, H] f32
    wqkv_ref, bqkv_ref,     # [L, H, 3H] bf16 (q cols pre-scaled), [L, 1, 3H] f32
    wo_ref, bo_ref,         # [L, H, H] bf16,  [L, 1, H] f32
    ln2_g_ref, ln2_b_ref,   # [L, 1, H] f32
    fc1_w_ref, fc1_b_ref,   # [L, H, MLP] bf16, [L, 1, MLP] f32
    fc2_w_ref, fc2_b_ref,   # [L, MLP, H] bf16, [L, 1, H] f32
    cls_w1_ref, cls_b1_ref, # [H, 512] bf16, [1, 512] f32
    cls_w2_ref, cls_b2_ref, # [512, NC] bf16, [1, NC] f32
    logits_ref,             # [B, NC] f32
    *, batch, crops, seq, heads, head_dim, layers, ln_eps):

    tok = batch * crops * seq
    hidden = heads * head_dim

    def layernorm(x, g, b):              # f32 VPU math (PyTorch biased variance)
        mu = jnp.mean(x, axis=-1, keepdims=True)
        var = jnp.mean((x - mu) ** 2, axis=-1, keepdims=True)
        return (x - mu) * jax.lax.rsqrt(var + ln_eps) * g + b

    def bdot(a_f32, w_bf16):             # bf16 MXU inputs, f32 accumulation
        return jnp.dot(a_f32.astype(jnp.bfloat16), w_bf16,
                       preferred_element_type=jnp.float32)

    # --- patch embedding (conv k=P, s=P, no bias) + CLS token + position embeddings ---
    h = jnp.dot(patches_ref[...], patch_w_ref[...],
                preferred_element_type=jnp.float32) + pos_ref[...]       # [TOK, H] f32

    # --- pre-LayerNorm (CLIP's pre_layrnorm) ---
    h = layernorm(h, pre_g_ref[...], pre_b_ref[...])

    bias = attn_bias_ref[...]                                            # [H*TOK, H*TOK] f32

    # --- transformer encoder layers (statically unrolled, weights stay in VMEM) ---
    for l in range(layers):
        # self-attention block: heads stacked along the sublane (row) axis.
        hn = layernorm(h, ln1_g_ref[l], ln1_b_ref[l])
        qkv = (bdot(hn, wqkv_ref[l]) + bqkv_ref[l]).astype(jnp.bfloat16)  # [TOK, 3H]
        q = jnp.concatenate(
            [qkv[:, hd * head_dim:(hd + 1) * head_dim] for hd in range(heads)], axis=0)
        k = jnp.concatenate(
            [qkv[:, hidden + hd * head_dim:hidden + (hd + 1) * head_dim]
             for hd in range(heads)], axis=0)
        v = jnp.concatenate(
            [qkv[:, 2 * hidden + hd * head_dim:2 * hidden + (hd + 1) * head_dim]
             for hd in range(heads)], axis=0)                             # [HEADS*TOK, Dh]

        # one QK^T, one softmax, one PV for all heads (scale folded into Wq).
        s = jnp.dot(q, k.T, preferred_element_type=jnp.float32) + bias    # [H*TOK, H*TOK] f32
        m = jnp.max(s, axis=-1, keepdims=True)
        p = jnp.exp(s - m)
        p = p * pl.reciprocal(jnp.sum(p, axis=-1, keepdims=True), approx=True)
        o = jnp.dot(p.astype(jnp.bfloat16), v,
                    preferred_element_type=jnp.float32)                   # [H*TOK, Dh] f32

        # unstack heads back to lanes, single fused out-projection.
        attn = jnp.concatenate(
            [o[hd * tok:(hd + 1) * tok, :] for hd in range(heads)], axis=1)  # [TOK, H]
        h = h + bdot(attn, wo_ref[l]) + bo_ref[l]

        # MLP block (quick_gelu: x * sigmoid(1.702 x), f32 on VPU/EUP)
        hn = layernorm(h, ln2_g_ref[l], ln2_b_ref[l])
        m1 = bdot(hn, fc1_w_ref[l]) + fc1_b_ref[l]
        m1 = m1 * jax.nn.sigmoid(1.702 * m1)
        h = h + bdot(m1, fc2_w_ref[l]) + fc2_b_ref[l]

    # --- last_hidden_state[:, 0, :] (no post_layernorm) + mean over crops ---
    # sel[b, t] = 1/crops if t is the CLS token of a crop of batch b else 0 (precomputed).
    v_cls = jnp.dot(sel_ref[...], h.astype(jnp.bfloat16),
                    preferred_element_type=jnp.float32)                   # [B, H]

    # --- classifier head: Linear -> ReLU -> Dropout(eval=identity) -> Linear ---
    z = bdot(v_cls, cls_w1_ref[...]) + cls_b1_ref[...]
    z = jnp.maximum(z, 0.0)
    logits_ref[...] = bdot(z, cls_w2_ref[...]) + cls_b2_ref[...]


# ---------------- parameters (deterministic synthetic init, f32 masters) ----------------
def init_params(key):
    keys = iter(jax.random.split(key, 32))

    def nrm(shape, scale=0.02):
        return scale * jax.random.normal(next(keys), shape, jnp.float32)

    ones = lambda *s: jnp.ones(s, jnp.float32)
    zeros = lambda *s: jnp.zeros(s, jnp.float32)
    L = LAYERS

    return {
        # TODO(synk): if real HF CLIP conv weights are ever loaded, the (C,P,P)
        # flatten order of patch_w columns must match the conv layout [H, C, P, P].
        "patch_w": nrm((CHANNELS * PATCH * PATCH, HIDDEN)),
        "class_emb": nrm((HIDDEN,)),
        "pos_emb": nrm((SEQ, HIDDEN)),
        "pre_ln_g": ones(1, HIDDEN), "pre_ln_b": zeros(1, HIDDEN),
        "ln1_g": ones(L, 1, HIDDEN), "ln1_b": zeros(L, 1, HIDDEN),
        "wqkv": nrm((L, HIDDEN, 3 * HIDDEN)), "bqkv": zeros(L, 1, 3 * HIDDEN),
        "wo": nrm((L, HIDDEN, HIDDEN)), "bo": zeros(L, 1, HIDDEN),
        "ln2_g": ones(L, 1, HIDDEN), "ln2_b": zeros(L, 1, HIDDEN),
        "fc1_w": nrm((L, HIDDEN, MLP_DIM)), "fc1_b": zeros(L, 1, MLP_DIM),
        "fc2_w": nrm((L, MLP_DIM, HIDDEN)), "fc2_b": zeros(L, 1, HIDDEN),
        "cls_w1": nrm((HIDDEN, CLS_HIDDEN)), "cls_b1": zeros(1, CLS_HIDDEN),
        "cls_w2": nrm((CLS_HIDDEN, NUM_CLASSES)), "cls_b2": zeros(1, NUM_CLASSES),
    }


def prepare_params(params):
    """Kernel-ready params: matmul weights in bf16 (halves HBM->VMEM DMA, avoids
    multi-pass f32 MXU), attention scale folded into the Q projection, class_emb
    folded into the CLS position row.  Biases / LN params stay f32 (VPU math)."""
    scale = float(HEAD_DIM) ** -0.5
    wqkv = params["wqkv"].at[:, :, :HIDDEN].multiply(scale)
    bqkv = params["bqkv"].at[:, :, :HIDDEN].multiply(scale)
    bf16 = lambda x: x.astype(jnp.bfloat16)
    return {
        "patch_w": bf16(params["patch_w"]),
        "cls_pos": params["pos_emb"].at[0].add(params["class_emb"]),   # [SEQ, H] f32
        "pre_ln_g": params["pre_ln_g"], "pre_ln_b": params["pre_ln_b"],
        "ln1_g": params["ln1_g"], "ln1_b": params["ln1_b"],
        "wqkv": bf16(wqkv), "bqkv": bqkv,
        "wo": bf16(params["wo"]), "bo": params["bo"],
        "ln2_g": params["ln2_g"], "ln2_b": params["ln2_b"],
        "fc1_w": bf16(params["fc1_w"]), "fc1_b": params["fc1_b"],
        "fc2_w": bf16(params["fc2_w"]), "fc2_b": params["fc2_b"],
        "cls_w1": bf16(params["cls_w1"]), "cls_b1": params["cls_b1"],
        "cls_w2": bf16(params["cls_w2"]), "cls_b2": params["cls_b2"],
    }


# ---------------- forward (mirrors CLIPImageClassifier.forward) ----------------
def clip_image_classifier(images, prep):
    if images.ndim == 5:                                   # [B, N, C, H, W]
        B, N, C, H, W = images.shape
        x = images.reshape(B * N, C, H, W)
    else:                                                  # [B, C, H, W]
        B, N = images.shape[0], 1
        x = images
        C, H, W = x.shape[1:]
    Beff = B * N

    nph, npw = H // PATCH, W // PATCH
    n_patches = nph * npw
    seq = n_patches + 1
    cpp = C * PATCH * PATCH
    tok = Beff * seq

    # im2col for Conv2d(kernel=PATCH, stride=PATCH, bias=False); one all-zero
    # "patch" row per crop is the CLS slot (its embedding is carried by cls_pos).
    patches = (x.reshape(Beff, C, nph, PATCH, npw, PATCH)
                .transpose(0, 2, 4, 1, 3, 5)
                .reshape(Beff, n_patches, cpp))
    patches_aug = jnp.concatenate(
        [jnp.zeros((Beff, 1, cpp), images.dtype), patches], axis=1
    ).reshape(tok, cpp).astype(jnp.bfloat16)               # bf16 MXU operand

    pos_full = jnp.tile(prep["cls_pos"], (Beff, 1))        # [tok, H] f32

    # Hoisted out of the kernel (perf feedback): block-diagonal additive attention
    # bias over (head, crop) for the head-row-stacked attention, and the CLS-token
    # selection / crop-mean matrix.  Both are tiny VMEM inputs.
    idx = jnp.arange(HEADS * tok)
    head_id = idx // tok
    crop_id = (idx % tok) // seq
    same = (head_id[:, None] == head_id[None, :]) & (crop_id[:, None] == crop_id[None, :])
    attn_bias = jnp.where(same, 0.0, -1e30).astype(jnp.float32)   # [HEADS*tok, HEADS*tok]

    t_idx = jnp.arange(tok)
    sel = ((t_idx[None, :] // (N * seq) == jnp.arange(B)[:, None])
           & (t_idx[None, :] % seq == 0))
    sel = (sel.astype(jnp.float32) / N).astype(jnp.bfloat16)      # [B, tok]

    kernel = functools.partial(
        _clip_forward_kernel,
        batch=B, crops=N, seq=seq, heads=HEADS, head_dim=HEAD_DIM,
        layers=LAYERS, ln_eps=LN_EPS)

    # Single fused, gridless pallas_call: every operand is a full VMEM block
    # (~250 KB total); only the [B, NUM_CLASSES] logits go back to HBM.
    # TODO(synk): for large batch/crops on v7x, add a 1-D "parallel" batch grid
    #             (dimension_semantics=("parallel",)) so both TensorCores run.
    # TODO(synk): for real CLIP dims (768 hidden / 12 layers / seq 197), stream
    #             weights per layer with a grid axis over L (index_map lambda l:
    #             (l,0,0)) instead of layer-stacked full-VMEM blocks (v7x: 64 MiB).
    return pl.pallas_call(
        kernel,
        out_shape=jax.ShapeDtypeStruct((B, NUM_CLASSES), jnp.float32),
    )(patches_aug, pos_full, attn_bias, sel,
      prep["patch_w"], prep["pre_ln_g"], prep["pre_ln_b"],
      prep["ln1_g"], prep["ln1_b"], prep["wqkv"], prep["bqkv"],
      prep["wo"], prep["bo"],
      prep["ln2_g"], prep["ln2_b"],
      prep["fc1_w"], prep["fc1_b"], prep["fc2_w"], prep["fc2_b"],
      prep["cls_w1"], prep["cls_b1"], prep["cls_w2"], prep["cls_b2"])


if __name__ == "__main__":
    key = jax.random.PRNGKey(0)
    pkey, xkey = jax.random.split(key)
    params = init_params(pkey)
    prep = prepare_params(params)

    # layout: NCHW images, 5-D multi-crop input [B, N, C, H, W]
    images = jax.random.normal(xkey, (2, 2, CHANNELS, IMG, IMG), jnp.float32)

    logits = jax.jit(lambda im: clip_image_classifier(im, prep))(images)
    jax.block_until_ready(logits)
    assert logits.shape == (2, NUM_CLASSES) and logits.dtype == jnp.float32
    assert bool(jnp.all(jnp.isfinite(logits)))
    print("KERNEL_OK")
</pallas_src>

<mosaic_0001>
module attributes {stable_mosaic.version = 11 : i64} {
  func.func @_clip_forward_kernel(%arg0: memref<20x768xbf16, #tpu.memory_space<vmem>>, %arg1: memref<20x32xf32, #tpu.memory_space<vmem>>, %arg2: memref<40x40xf32, #tpu.memory_space<vmem>>, %arg3: memref<2x20xbf16, #tpu.memory_space<vmem>>, %arg4: memref<768x32xbf16, #tpu.memory_space<vmem>>, %arg5: memref<1x32xf32, #tpu.memory_space<vmem>>, %arg6: memref<1x32xf32, #tpu.memory_space<vmem>>, %arg7: memref<2x1x32xf32, #tpu.memory_space<vmem>>, %arg8: memref<2x1x32xf32, #tpu.memory_space<vmem>>, %arg9: memref<2x32x96xbf16, #tpu.memory_space<vmem>>, %arg10: memref<2x1x96xf32, #tpu.memory_space<vmem>>, %arg11: memref<2x32x32xbf16, #tpu.memory_space<vmem>>, %arg12: memref<2x1x32xf32, #tpu.memory_space<vmem>>, %arg13: memref<2x1x32xf32, #tpu.memory_space<vmem>>, %arg14: memref<2x1x32xf32, #tpu.memory_space<vmem>>, %arg15: memref<2x32x128xbf16, #tpu.memory_space<vmem>>, %arg16: memref<2x1x128xf32, #tpu.memory_space<vmem>>, %arg17: memref<2x128x32xbf16, #tpu.memory_space<vmem>>, %arg18: memref<2x1x32xf32, #tpu.memory_space<vmem>>, %arg19: memref<32x512xbf16, #tpu.memory_space<vmem>>, %arg20: memref<1x512xf32, #tpu.memory_space<vmem>>, %arg21: memref<512x6xbf16, #tpu.memory_space<vmem>>, %arg22: memref<1x6xf32, #tpu.memory_space<vmem>>, %arg23: memref<2x6xf32, #tpu.memory_space<vmem>>) attributes {dimension_semantics = [], scalar_prefetch = 0 : i64, scratch_operands = 0 : i64, tpu.core_type = #tpu.core_type<tc>} {
    %c0 = arith.constant 0 : index
    %c0_0 = arith.constant 0 : index
    %0 = vector.load %arg0[%c0, %c0_0] : memref<20x768xbf16, #tpu.memory_space<vmem>>, vector<20x768xbf16>
    %c0_1 = arith.constant 0 : index
    %c0_2 = arith.constant 0 : index
    %1 = vector.load %arg4[%c0_1, %c0_2] : memref<768x32xbf16, #tpu.memory_space<vmem>>, vector<768x32xbf16>
    %cst = arith.constant dense<0.000000e+00> : vector<20x32xf32>
    %2 = tpu.matmul %0, %1, %cst {dimension_numbers = #tpu.dot_dimension_numbers<[1], [0], [0], [1], [0, 0, 1, 1], [], []>} : vector<20x768xbf16>, vector<768x32xbf16>, vector<20x32xf32> -> vector<20x32xf32>
    %c0_3 = arith.constant 0 : index
    %c0_4 = arith.constant 0 : index
    %3 = vector.load %arg1[%c0_3, %c0_4] : memref<20x32xf32, #tpu.memory_space<vmem>>, vector<20x32xf32>
    %4 = arith.addf %2, %3 : vector<20x32xf32>
    %c0_5 = arith.constant 0 : index
    %c0_6 = arith.constant 0 : index
    %5 = vector.load %arg5[%c0_5, %c0_6] : memref<1x32xf32, #tpu.memory_space<vmem>>, vector<1x32xf32>
    %c0_7 = arith.constant 0 : index
    %c0_8 = arith.constant 0 : index
    %6 = vector.load %arg6[%c0_7, %c0_8] : memref<1x32xf32, #tpu.memory_space<vmem>>, vector<1x32xf32>
    %cst_9 = arith.constant dense<0.000000e+00> : vector<20xf32>
    %7 = vector.multi_reduction <add>, %4, %cst_9 [1] : vector<20x32xf32> to vector<20xf32>
    %8 = vector.shape_cast %7 : vector<20xf32> to vector<20x1xf32>
    %cst_10 = arith.constant 3.200000e+01 : f32
    %9 = vector.broadcast %cst_10 : f32 to vector<20x1xf32>
    %10 = arith.divf %8, %9 : vector<20x1xf32>
    %11 = vector.broadcast %10 : vector<20x1xf32> to vector<20x32xf32>
    %12 = arith.subf %4, %11 : vector<20x32xf32>
    %13 = arith.mulf %12, %12 : vector<20x32xf32>
    %cst_11 = arith.constant dense<0.000000e+00> : vector<20xf32>
    %14 = vector.multi_reduction <add>, %13, %cst_11 [1] : vector<20x32xf32> to vector<20xf32>
    %15 = vector.shape_cast %14 : vector<20xf32> to vector<20x1xf32>
    %cst_12 = arith.constant 3.200000e+01 : f32
    %16 = vector.broadcast %cst_12 : f32 to vector<20x1xf32>
    %17 = arith.divf %15, %16 : vector<20x1xf32>
    %18 = vector.broadcast %10 : vector<20x1xf32> to vector<20x32xf32>
    %19 = arith.subf %4, %18 : vector<20x32xf32>
    %cst_13 = arith.constant 9.99999974E-6 : f32
    %20 = vector.broadcast %cst_13 : f32 to vector<20x1xf32>
    %21 = arith.addf %17, %20 : vector<20x1xf32>
    %22 = math.rsqrt %21 : vector<20x1xf32>
    %23 = vector.broadcast %22 : vector<20x1xf32> to vector<20x32xf32>
    %24 = arith.mulf %19, %23 : vector<20x32xf32>
    %25 = vector.broadcast %5 : vector<1x32xf32> to vector<20x32xf32>
    %26 = arith.mulf %24, %25 : vector<20x32xf32>
    %27 = vector.broadcast %6 : vector<1x32xf32> to vector<20x32xf32>
    %28 = arith.addf %26, %27 : vector<20x32xf32>
    %c0_14 = arith.constant 0 : index
    %c0_15 = arith.constant 0 : index
    %29 = vector.load %arg2[%c0_14, %c0_15] : memref<40x40xf32, #tpu.memory_space<vmem>>, vector<40x40xf32>
    %c0_16 = arith.constant 0 : index
    %c0_17 = arith.constant 0 : index
    %c0_18 = arith.constant 0 : index
    %30 = vector.load %arg7[%c0_16, %c0_17, %c0_18] : memref<2x1x32xf32, #tpu.memory_space<vmem>>, vector<1x1x32xf32>
    %31 = vector.shape_cast %30 : vector<1x1x32xf32> to vector<1x32xf32>
    %c0_19 = arith.constant 0 : index
    %c0_20 = arith.constant 0 : index
    %c0_21 = arith.constant 0 : index
    %32 = vector.load %arg8[%c0_19, %c0_20, %c0_21] : memref<2x1x32xf32, #tpu.memory_space<vmem>>, vector<1x1x32xf32>
    %33 = vector.shape_cast %32 : vector<1x1x32xf32> to vector<1x32xf32>
    %cst_22 = arith.constant dense<0.000000e+00> : vector<20xf32>
    %34 = vector.multi_reduction <add>, %28, %cst_22 [1] : vector<20x32xf32> to vector<20xf32>
    %35 = vector.shape_cast %34 : vector<20xf32> to vector<20x1xf32>
    %cst_23 = arith.constant 3.200000e+01 : f32
    %36 = vector.broadcast %cst_23 : f32 to vector<20x1xf32>
    %37 = arith.divf %35, %36 : vector<20x1xf32>
    %38 = vector.broadcast %37 : vector<20x1xf32> to vector<20x32xf32>
    %39 = arith.subf %28, %38 : vector<20x32xf32>
    %40 = arith.mulf %39, %39 : vector<20x32xf32>
    %cst_24 = arith.constant dense<0.000000e+00> : vector<20xf32>
    %41 = vector.multi_reduction <add>, %40, %cst_24 [1] : vector<20x32xf32> to vector<20xf32>
    %42 = vector.shape_cast %41 : vector<20xf32> to vector<20x1xf32>
    %cst_25 = arith.constant 3.200000e+01 : f32
    %43 = vector.broadcast %cst_25 : f32 to vector<20x1xf32>
    %44 = arith.divf %42, %43 : vector<20x1xf32>
    %45 = vector.broadcast %37 : vector<20x1xf32> to vector<20x32xf32>
    %46 = arith.subf %28, %45 : vector<20x32xf32>
    %cst_26 = arith.constant 9.99999974E-6 : f32
    %47 = vector.broadcast %cst_26 : f32 to vector<20x1xf32>
    %48 = arith.addf %44, %47 : vector<20x1xf32>
    %49 = math.rsqrt %48 : vector<20x1xf32>
    %50 = vector.broadcast %49 : vector<20x1xf32> to vector<20x32xf32>
    %51 = arith.mulf %46, %50 : vector<20x32xf32>
    %52 = vector.broadcast %31 : vector<1x32xf32> to vector<20x32xf32>
    %53 = arith.mulf %51, %52 : vector<20x32xf32>
    %54 = vector.broadcast %33 : vector<1x32xf32> to vector<20x32xf32>
    %55 = arith.addf %53, %54 : vector<20x32xf32>
    %c0_27 = arith.constant 0 : index
    %c0_28 = arith.constant 0 : index
    %c0_29 = arith.constant 0 : index
    %56 = vector.load %arg9[%c0_27, %c0_28, %c0_29] : memref<2x32x96xbf16, #tpu.memory_space<vmem>>, vector<1x32x96xbf16>
    %57 = vector.shape_cast %56 : vector<1x32x96xbf16> to vector<32x96xbf16>
    %58 = arith.truncf %55 : vector<20x32xf32> to vector<20x32xbf16>
    %cst_30 = arith.constant dense<0.000000e+00> : vector<20x96xf32>
    %59 = tpu.matmul %58, %57, %cst_30 {dimension_numbers = #tpu.dot_dimension_numbers<[1], [0], [0], [1], [0, 0, 1, 1], [], []>} : vector<20x32xbf16>, vector<32x96xbf16>, vector<20x96xf32> -> vector<20x96xf32>
    %c0_31 = arith.constant 0 : index
    %c0_32 = arith.constant 0 : index
    %c0_33 = arith.constant 0 : index
    %60 = vector.load %arg10[%c0_31, %c0_32, %c0_33] : memref<2x1x96xf32, #tpu.memory_space<vmem>>, vector<1x1x96xf32>
    %61 = vector.shape_cast %60 : vector<1x1x96xf32> to vector<1x96xf32>
    %62 = vector.broadcast %61 : vector<1x96xf32> to vector<20x96xf32>
    %63 = arith.addf %59, %62 : vector<20x96xf32>
    %64 = arith.truncf %63 : vector<20x96xf32> to vector<20x96xbf16>
    %65 = vector.extract_strided_slice %64 {offsets = [0, 0], sizes = [20, 16], strides = [1, 1]} : vector<20x96xbf16> to vector<20x16xbf16>
    %66 = vector.extract_strided_slice %64 {offsets = [0, 16], sizes = [20, 16], strides = [1, 1]} : vector<20x96xbf16> to vector<20x16xbf16>
    %67 = tpu.concatenate %65, %66 in 0 : vector<20x16xbf16>, vector<20x16xbf16> -> vector<40x16xbf16>
    %68 = vector.extract_strided_slice %64 {offsets = [0, 32], sizes = [20, 16], strides = [1, 1]} : vector<20x96xbf16> to vector<20x16xbf16>
    %69 = vector.extract_strided_slice %64 {offsets = [0, 48], sizes = [20, 16], strides = [1, 1]} : vector<20x96xbf16> to vector<20x16xbf16>
    %70 = tpu.concatenate %68, %69 in 0 : vector<20x16xbf16>, vector<20x16xbf16> -> vector<40x16xbf16>
    %71 = vector.extract_strided_slice %64 {offsets = [0, 64], sizes = [20, 16], strides = [1, 1]} : vector<20x96xbf16> to vector<20x16xbf16>
    %72 = vector.extract_strided_slice %64 {offsets = [0, 80], sizes = [20, 16], strides = [1, 1]} : vector<20x96xbf16> to vector<20x16xbf16>
    %73 = tpu.concatenate %71, %72 in 0 : vector<20x16xbf16>, vector<20x16xbf16> -> vector<40x16xbf16>
    %74 = tpu.transpose %70, [1, 0] : vector<40x16xbf16> -> vector<16x40xbf16>
    %cst_34 = arith.constant dense<0.000000e+00> : vector<40x40xf32>
    %75 = tpu.matmul %67, %74, %cst_34 {dimension_numbers = #tpu.dot_dimension_numbers<[1], [0], [0], [1], [0, 0, 1, 1], [], []>} : vector<40x16xbf16>, vector<16x40xbf16>, vector<40x40xf32> -> vector<40x40xf32>
    %76 = arith.addf %75, %29 : vector<40x40xf32>
    %cst_35 = arith.constant dense<0xFF800000> : vector<40xf32>
    %77 = vector.multi_reduction <maximumf>, %76, %cst_35 [1] : vector<40x40xf32> to vector<40xf32>
    %78 = vector.shape_cast %77 : vector<40xf32> to vector<40x1xf32>
    %79 = vector.broadcast %78 : vector<40x1xf32> to vector<40x40xf32>
    %80 = arith.subf %76, %79 : vector<40x40xf32>
    %81 = math.exp %80 : vector<40x40xf32>
    %cst_36 = arith.constant dense<0.000000e+00> : vector<40xf32>
    %82 = vector.multi_reduction <add>, %81, %cst_36 [1] : vector<40x40xf32> to vector<40xf32>
    %83 = vector.shape_cast %82 : vector<40xf32> to vector<40x1xf32>
    %84 = tpu.reciprocal %83 {approx = true} : vector<40x1xf32> -> vector<40x1xf32>
    %85 = vector.broadcast %84 : vector<40x1xf32> to vector<40x40xf32>
    %86 = arith.mulf %81, %85 : vector<40x40xf32>
    %87 = arith.truncf %86 : vector<40x40xf32> to vector<40x40xbf16>
    %cst_37 = arith.constant dense<0.000000e+00> : vector<40x16xf32>
    %88 = tpu.matmul %87, %73, %cst_37 {dimension_numbers = #tpu.dot_dimension_numbers<[1], [0], [0], [1], [0, 0, 1, 1], [], []>} : vector<40x40xbf16>, vector<40x16xbf16>, vector<40x16xf32> -> vector<40x16xf32>
    %89 = vector.extract_strided_slice %88 {offsets = [0, 0], sizes = [20, 16], strides = [1, 1]} : vector<40x16xf32> to vector<20x16xf32>
    %90 = vector.extract_strided_slice %88 {offsets = [20, 0], sizes = [20, 16], strides = [1, 1]} : vector<40x16xf32> to vector<20x16xf32>
    %91 = tpu.concatenate %89, %90 in 1 : vector<20x16xf32>, vector<20x16xf32> -> vector<20x32xf32>
    %c0_38 = arith.constant 0 : index
    %c0_39 = arith.constant 0 : index
    %c0_40 = arith.constant 0 : index
    %92 = vector.load %arg11[%c0_38, %c0_39, %c0_40] : memref<2x32x32xbf16, #tpu.memory_space<vmem>>, vector<1x32x32xbf16>
    %93 = vector.shape_cast %92 : vector<1x32x32xbf16> to vector<32x32xbf16>
    %94 = arith.truncf %91 : vector<20x32xf32> to vector<20x32xbf16>
    %cst_41 = arith.constant dense<0.000000e+00> : vector<20x32xf32>
    %95 = tpu.matmul %94, %93, %cst_41 {dimension_numbers = #tpu.dot_dimension_numbers<[1], [0], [0], [1], [0, 0, 1, 1], [], []>} : vector<20x32xbf16>, vector<32x32xbf16>, vector<20x32xf32> -> vector<20x32xf32>
    %96 = arith.addf %28, %95 : vector<20x32xf32>
    %c0_42 = arith.constant 0 : index
    %c0_43 = arith.constant 0 : index
    %c0_44 = arith.constant 0 : index
    %97 = vector.load %arg12[%c0_42, %c0_43, %c0_44] : memref<2x1x32xf32, #tpu.memory_space<vmem>>, vector<1x1x32xf32>
    %98 = vector.shape_cast %97 : vector<1x1x32xf32> to vector<1x32xf32>
    %99 = vector.broadcast %98 : vector<1x32xf32> to vector<20x32xf32>
    %100 = arith.addf %96, %99 : vector<20x32xf32>
    %c0_45 = arith.constant 0 : index
    %c0_46 = arith.constant 0 : index
    %c0_47 = arith.constant 0 : index
    %101 = vector.load %arg13[%c0_45, %c0_46, %c0_47] : memref<2x1x32xf32, #tpu.memory_space<vmem>>, vector<1x1x32xf32>
    %102 = vector.shape_cast %101 : vector<1x1x32xf32> to vector<1x32xf32>
    %c0_48 = arith.constant 0 : index
    %c0_49 = arith.constant 0 : index
    %c0_50 = arith.constant 0 : index
    %103 = vector.load %arg14[%c0_48, %c0_49, %c0_50] : memref<2x1x32xf32, #tpu.memory_space<vmem>>, vector<1x1x32xf32>
    %104 = vector.shape_cast %103 : vector<1x1x32xf32> to vector<1x32xf32>
    %cst_51 = arith.constant dense<0.000000e+00> : vector<20xf32>
    %105 = vector.multi_reduction <add>, %100, %cst_51 [1] : vector<20x32xf32> to vector<20xf32>
    %106 = vector.shape_cast %105 : vector<20xf32> to vector<20x1xf32>
    %cst_52 = arith.constant 3.200000e+01 : f32
    %107 = vector.broadcast %cst_52 : f32 to vector<20x1xf32>
    %108 = arith.divf %106, %107 : vector<20x1xf32>
    %109 = vector.broadcast %108 : vector<20x1xf32> to vector<20x32xf32>
    %110 = arith.subf %100, %109 : vector<20x32xf32>
    %111 = arith.mulf %110, %110 : vector<20x32xf32>
    %cst_53 = arith.constant dense<0.000000e+00> : vector<20xf32>
    %112 = vector.multi_reduction <add>, %111, %cst_53 [1] : vector<20x32xf32> to vector<20xf32>
    %113 = vector.shape_cast %112 : vector<20xf32> to vector<20x1xf32>
    %cst_54 = arith.constant 3.200000e+01 : f32
    %114 = vector.broadcast %cst_54 : f32 to vector<20x1xf32>
    %115 = arith.divf %113, %114 : vector<20x1xf32>
    %116 = vector.broadcast %108 : vector<20x1xf32> to vector<20x32xf32>
    %117 = arith.subf %100, %116 : vector<20x32xf32>
    %cst_55 = arith.constant 9.99999974E-6 : f32
    %118 = vector.broadcast %cst_55 : f32 to vector<20x1xf32>
    %119 = arith.addf %115, %118 : vector<20x1xf32>
    %120 = math.rsqrt %119 : vector<20x1xf32>
    %121 = vector.broadcast %120 : vector<20x1xf32> to vector<20x32xf32>
    %122 = arith.mulf %117, %121 : vector<20x32xf32>
    %123 = vector.broadcast %102 : vector<1x32xf32> to vector<20x32xf32>
    %124 = arith.mulf %122, %123 : vector<20x32xf32>
    %125 = vector.broadcast %104 : vector<1x32xf32> to vector<20x32xf32>
    %126 = arith.addf %124, %125 : vector<20x32xf32>
    %c0_56 = arith.constant 0 : index
    %c0_57 = arith.constant 0 : index
    %c0_58 = arith.constant 0 : index
    %127 = vector.load %arg15[%c0_56, %c0_57, %c0_58] : memref<2x32x128xbf16, #tpu.memory_space<vmem>>, vector<1x32x128xbf16>
    %128 = vector.shape_cast %127 : vector<1x32x128xbf16> to vector<32x128xbf16>
    %129 = arith.truncf %126 : vector<20x32xf32> to vector<20x32xbf16>
    %cst_59 = arith.constant dense<0.000000e+00> : vector<20x128xf32>
    %130 = tpu.matmul %129, %128, %cst_59 {dimension_numbers = #tpu.dot_dimension_numbers<[1], [0], [0], [1], [0, 0, 1, 1], [], []>} : vector<20x32xbf16>, vector<32x128xbf16>, vector<20x128xf32> -> vector<20x128xf32>
    %c0_60 = arith.constant 0 : index
    %c0_61 = arith.constant 0 : index
    %c0_62 = arith.constant 0 : index
    %131 = vector.load %arg16[%c0_60, %c0_61, %c0_62] : memref<2x1x128xf32, #tpu.memory_space<vmem>>, vector<1x1x128xf32>
    %132 = vector.shape_cast %131 : vector<1x1x128xf32> to vector<1x128xf32>
    %133 = vector.broadcast %132 : vector<1x128xf32> to vector<20x128xf32>
    %134 = arith.addf %130, %133 : vector<20x128xf32>
    %cst_63 = arith.constant 1.702000e+00 : f32
    %135 = vector.broadcast %cst_63 : f32 to vector<20x128xf32>
    %136 = arith.mulf %135, %134 : vector<20x128xf32>
    %137 = arith.negf %136 : vector<20x128xf32>
    %138 = math.exp %137 : vector<20x128xf32>
    %cst_64 = arith.constant 1.000000e+00 : f32
    %139 = vector.broadcast %cst_64 : f32 to vector<20x128xf32>
    %140 = arith.addf %139, %138 : vector<20x128xf32>
    %141 = arith.divf %139, %140 : vector<20x128xf32>
    %142 = arith.mulf %134, %141 : vector<20x128xf32>
    %c0_65 = arith.constant 0 : index
    %c0_66 = arith.constant 0 : index
    %c0_67 = arith.constant 0 : index
    %143 = vector.load %arg17[%c0_65, %c0_66, %c0_67] : memref<2x128x32xbf16, #tpu.memory_space<vmem>>, vector<1x128x32xbf16>
    %144 = vector.shape_cast %143 : vector<1x128x32xbf16> to vector<128x32xbf16>
    %145 = arith.truncf %142 : vector<20x128xf32> to vector<20x128xbf16>
    %cst_68 = arith.constant dense<0.000000e+00> : vector<20x32xf32>
    %146 = tpu.matmul %145, %144, %cst_68 {dimension_numbers = #tpu.dot_dimension_numbers<[1], [0], [0], [1], [0, 0, 1, 1], [], []>} : vector<20x128xbf16>, vector<128x32xbf16>, vector<20x32xf32> -> vector<20x32xf32>
    %147 = arith.addf %100, %146 : vector<20x32xf32>
    %c0_69 = arith.constant 0 : index
    %c0_70 = arith.constant 0 : index
    %c0_71 = arith.constant 0 : index
    %148 = vector.load %arg18[%c0_69, %c0_70, %c0_71] : memref<2x1x32xf32, #tpu.memory_space<vmem>>, vector<1x1x32xf32>
    %149 = vector.shape_cast %148 : vector<1x1x32xf32> to vector<1x32xf32>
    %150 = vector.broadcast %149 : vector<1x32xf32> to vector<20x32xf32>
    %151 = arith.addf %147, %150 : vector<20x32xf32>
    %c1 = arith.constant 1 : index
    %c0_72 = arith.constant 0 : index
    %c0_73 = arith.constant 0 : index
    %152 = vector.load %arg7[%c1, %c0_72, %c0_73] : memref<2x1x32xf32, #tpu.memory_space<vmem>>, vector<1x1x32xf32>
    %153 = vector.shape_cast %152 : vector<1x1x32xf32> to vector<1x32xf32>
    %c1_74 = arith.constant 1 : index
    %c0_75 = arith.constant 0 : index
    %c0_76 = arith.constant 0 : index
    %154 = vector.load %arg8[%c1_74, %c0_75, %c0_76] : memref<2x1x32xf32, #tpu.memory_space<vmem>>, vector<1x1x32xf32>
    %155 = vector.shape_cast %154 : vector<1x1x32xf32> to vector<1x32xf32>
    %cst_77 = arith.constant dense<0.000000e+00> : vector<20xf32>
    %156 = vector.multi_reduction <add>, %151, %cst_77 [1] : vector<20x32xf32> to vector<20xf32>
    %157 = vector.shape_cast %156 : vector<20xf32> to vector<20x1xf32>
    %cst_78 = arith.constant 3.200000e+01 : f32
    %158 = vector.broadcast %cst_78 : f32 to vector<20x1xf32>
    %159 = arith.divf %157, %158 : vector<20x1xf32>
    %160 = vector.broadcast %159 : vector<20x1xf32> to vector<20x32xf32>
    %161 = arith.subf %151, %160 : vector<20x32xf32>
    %162 = arith.mulf %161, %161 : vector<20x32xf32>
    %cst_79 = arith.constant dense<0.000000e+00> : vector<20xf32>
    %163 = vector.multi_reduction <add>, %162, %cst_79 [1] : vector<20x32xf32> to vector<20xf32>
    %164 = vector.shape_cast %163 : vector<20xf32> to vector<20x1xf32>
    %cst_80 = arith.constant 3.200000e+01 : f32
    %165 = vector.broadcast %cst_80 : f32 to vector<20x1xf32>
    %166 = arith.divf %164, %165 : vector<20x1xf32>
    %167 = vector.broadcast %159 : vector<20x1xf32> to vector<20x32xf32>
    %168 = arith.subf %151, %167 : vector<20x32xf32>
    %cst_81 = arith.constant 9.99999974E-6 : f32
    %169 = vector.broadcast %cst_81 : f32 to vector<20x1xf32>
    %170 = arith.addf %166, %169 : vector<20x1xf32>
    %171 = math.rsqrt %170 : vector<20x1xf32>
    %172 = vector.broadcast %171 : vector<20x1xf32> to vector<20x32xf32>
    %173 = arith.mulf %168, %172 : vector<20x32xf32>
    %174 = vector.broadcast %153 : vector<1x32xf32> to vector<20x32xf32>
    %175 = arith.mulf %173, %174 : vector<20x32xf32>
    %176 = vector.broadcast %155 : vector<1x32xf32> to vector<20x32xf32>
    %177 = arith.addf %175, %176 : vector<20x32xf32>
    %c1_82 = arith.constant 1 : index
    %c0_83 = arith.constant 0 : index
    %c0_84 = arith.constant 0 : index
    %178 = vector.load %arg9[%c1_82, %c0_83, %c0_84] : memref<2x32x96xbf16, #tpu.memory_space<vmem>>, vector<1x32x96xbf16>
    %179 = vector.shape_cast %178 : vector<1x32x96xbf16> to vector<32x96xbf16>
    %180 = arith.truncf %177 : vector<20x32xf32> to vector<20x32xbf16>
    %cst_85 = arith.constant dense<0.000000e+00> : vector<20x96xf32>
    %181 = tpu.matmul %180, %179, %cst_85 {dimension_numbers = #tpu.dot_dimension_numbers<[1], [0], [0], [1], [0, 0, 1, 1], [], []>} : vector<20x32xbf16>, vector<32x96xbf16>, vector<20x96xf32> -> vector<20x96xf32>
    %c1_86 = arith.constant 1 : index
    %c0_87 = arith.constant 0 : index
    %c0_88 = arith.constant 0 : index
    %182 = vector.load %arg10[%c1_86, %c0_87, %c0_88] : memref<2x1x96xf32, #tpu.memory_space<vmem>>, vector<1x1x96xf32>
    %183 = vector.shape_cast %182 : vector<1x1x96xf32> to vector<1x96xf32>
    %184 = vector.broadcast %183 : vector<1x96xf32> to vector<20x96xf32>
    %185 = arith.addf %181, %184 : vector<20x96xf32>
    %186 = arith.truncf %185 : vector<20x96xf32> to vector<20x96xbf16>
    %187 = vector.extract_strided_slice %186 {offsets = [0, 0], sizes = [20, 16], strides = [1, 1]} : vector<20x96xbf16> to vector<20x16xbf16>
    %188 = vector.extract_strided_slice %186 {offsets = [0, 16], sizes = [20, 16], strides = [1, 1]} : vector<20x96xbf16> to vector<20x16xbf16>
    %189 = tpu.concatenate %187, %188 in 0 : vector<20x16xbf16>, vector<20x16xbf16> -> vector<40x16xbf16>
    %190 = vector.extract_strided_slice %186 {offsets = [0, 32], sizes = [20, 16], strides = [1, 1]} : vector<20x96xbf16> to vector<20x16xbf16>
    %191 = vector.extract_strided_slice %186 {offsets = [0, 48], sizes = [20, 16], strides = [1, 1]} : vector<20x96xbf16> to vector<20x16xbf16>
    %192 = tpu.concatenate %190, %191 in 0 : vector<20x16xbf16>, vector<20x16xbf16> -> vector<40x16xbf16>
    %193 = vector.extract_strided_slice %186 {offsets = [0, 64], sizes = [20, 16], strides = [1, 1]} : vector<20x96xbf16> to vector<20x16xbf16>
    %194 = vector.extract_strided_slice %186 {offsets = [0, 80], sizes = [20, 16], strides = [1, 1]} : vector<20x96xbf16> to vector<20x16xbf16>
    %195 = tpu.concatenate %193, %194 in 0 : vector<20x16xbf16>, vector<20x16xbf16> -> vector<40x16xbf16>
    %196 = tpu.transpose %192, [1, 0] : vector<40x16xbf16> -> vector<16x40xbf16>
    %cst_89 = arith.constant dense<0.000000e+00> : vector<40x40xf32>
    %197 = tpu.matmul %189, %196, %cst_89 {dimension_numbers = #tpu.dot_dimension_numbers<[1], [0], [0], [1], [0, 0, 1, 1], [], []>} : vector<40x16xbf16>, vector<16x40xbf16>, vector<40x40xf32> -> vector<40x40xf32>
    %198 = arith.addf %197, %29 : vector<40x40xf32>
    %cst_90 = arith.constant dense<0xFF800000> : vector<40xf32>
    %199 = vector.multi_reduction <maximumf>, %198, %cst_90 [1] : vector<40x40xf32> to vector<40xf32>
    %200 = vector.shape_cast %199 : vector<40xf32> to vector<40x1xf32>
    %201 = vector.broadcast %200 : vector<40x1xf32> to vector<40x40xf32>
    %202 = arith.subf %198, %201 : vector<40x40xf32>
    %203 = math.exp %202 : vector<40x40xf32>
    %cst_91 = arith.constant dense<0.000000e+00> : vector<40xf32>
    %204 = vector.multi_reduction <add>, %203, %cst_91 [1] : vector<40x40xf32> to vector<40xf32>
    %205 = vector.shape_cast %204 : vector<40xf32> to vector<40x1xf32>
    %206 = tpu.reciprocal %205 {approx = true} : vector<40x1xf32> -> vector<40x1xf32>
    %207 = vector.broadcast %206 : vector<40x1xf32> to vector<40x40xf32>
    %208 = arith.mulf %203, %207 : vector<40x40xf32>
    %209 = arith.truncf %208 : vector<40x40xf32> to vector<40x40xbf16>
    %cst_92 = arith.constant dense<0.000000e+00> : vector<40x16xf32>
    %210 = tpu.matmul %209, %195, %cst_92 {dimension_numbers = #tpu.dot_dimension_numbers<[1], [0], [0], [1], [0, 0, 1, 1], [], []>} : vector<40x40xbf16>, vector<40x16xbf16>, vector<40x16xf32> -> vector<40x16xf32>
    %211 = vector.extract_strided_slice %210 {offsets = [0, 0], sizes = [20, 16], strides = [1, 1]} : vector<40x16xf32> to vector<20x16xf32>
    %212 = vector.extract_strided_slice %210 {offsets = [20, 0], sizes = [20, 16], strides = [1, 1]} : vector<40x16xf32> to vector<20x16xf32>
    %213 = tpu.concatenate %211, %212 in 1 : vector<20x16xf32>, vector<20x16xf32> -> vector<20x32xf32>
    %c1_93 = arith.constant 1 : index
    %c0_94 = arith.constant 0 : index
    %c0_95 = arith.constant 0 : index
    %214 = vector.load %arg11[%c1_93, %c0_94, %c0_95] : memref<2x32x32xbf16, #tpu.memory_space<vmem>>, vector<1x32x32xbf16>
    %215 = vector.shape_cast %214 : vector<1x32x32xbf16> to vector<32x32xbf16>
    %216 = arith.truncf %213 : vector<20x32xf32> to vector<20x32xbf16>
    %cst_96 = arith.constant dense<0.000000e+00> : vector<20x32xf32>
    %217 = tpu.matmul %216, %215, %cst_96 {dimension_numbers = #tpu.dot_dimension_numbers<[1], [0], [0], [1], [0, 0, 1, 1], [], []>} : vector<20x32xbf16>, vector<32x32xbf16>, vector<20x32xf32> -> vector<20x32xf32>
    %218 = arith.addf %151, %217 : vector<20x32xf32>
    %c1_97 = arith.constant 1 : index
    %c0_98 = arith.constant 0 : index
    %c0_99 = arith.constant 0 : index
    %219 = vector.load %arg12[%c1_97, %c0_98, %c0_99] : memref<2x1x32xf32, #tpu.memory_space<vmem>>, vector<1x1x32xf32>
    %220 = vector.shape_cast %219 : vector<1x1x32xf32> to vector<1x32xf32>
    %221 = vector.broadcast %220 : vector<1x32xf32> to vector<20x32xf32>
    %222 = arith.addf %218, %221 : vector<20x32xf32>
    %c1_100 = arith.constant 1 : index
    %c0_101 = arith.constant 0 : index
    %c0_102 = arith.constant 0 : index
    %223 = vector.load %arg13[%c1_100, %c0_101, %c0_102] : memref<2x1x32xf32, #tpu.memory_space<vmem>>, vector<1x1x32xf32>
    %224 = vector.shape_cast %223 : vector<1x1x32xf32> to vector<1x32xf32>
    %c1_103 = arith.constant 1 : index
    %c0_104 = arith.constant 0 : index
    %c0_105 = arith.constant 0 : index
    %225 = vector.load %arg14[%c1_103, %c0_104, %c0_105] : memref<2x1x32xf32, #tpu.memory_space<vmem>>, vector<1x1x32xf32>
    %226 = vector.shape_cast %225 : vector<1x1x32xf32> to vector<1x32xf32>
    %cst_106 = arith.constant dense<0.000000e+00> : vector<20xf32>
    %227 = vector.multi_reduction <add>, %222, %cst_106 [1] : vector<20x32xf32> to vector<20xf32>
    %228 = vector.shape_cast %227 : vector<20xf32> to vector<20x1xf32>
    %cst_107 = arith.constant 3.200000e+01 : f32
    %229 = vector.broadcast %cst_107 : f32 to vector<20x1xf32>
    %230 = arith.divf %228, %229 : vector<20x1xf32>
    %231 = vector.broadcast %230 : vector<20x1xf32> to vector<20x32xf32>
    %232 = arith.subf %222, %231 : vector<20x32xf32>
    %233 = arith.mulf %232, %232 : vector<20x32xf32>
    %cst_108 = arith.constant dense<0.000000e+00> : vector<20xf32>
    %234 = vector.multi_reduction <add>, %233, %cst_108 [1] : vector<20x32xf32> to vector<20xf32>
    %235 = vector.shape_cast %234 : vector<20xf32> to vector<20x1xf32>
    %cst_109 = arith.constant 3.200000e+01 : f32
    %236 = vector.broadcast %cst_109 : f32 to vector<20x1xf32>
    %237 = arith.divf %235, %236 : vector<20x1xf32>
    %238 = vector.broadcast %230 : vector<20x1xf32> to vector<20x32xf32>
    %239 = arith.subf %222, %238 : vector<20x32xf32>
    %cst_110 = arith.constant 9.99999974E-6 : f32
    %240 = vector.broadcast %cst_110 : f32 to vector<20x1xf32>
    %241 = arith.addf %237, %240 : vector<20x1xf32>
    %242 = math.rsqrt %241 : vector<20x1xf32>
    %243 = vector.broadcast %242 : vector<20x1xf32> to vector<20x32xf32>
    %244 = arith.mulf %239, %243 : vector<20x32xf32>
    %245 = vector.broadcast %224 : vector<1x32xf32> to vector<20x32xf32>
    %246 = arith.mulf %244, %245 : vector<20x32xf32>
    %247 = vector.broadcast %226 : vector<1x32xf32> to vector<20x32xf32>
    %248 = arith.addf %246, %247 : vector<20x32xf32>
    %c1_111 = arith.constant 1 : index
    %c0_112 = arith.constant 0 : index
    %c0_113 = arith.constant 0 : index
    %249 = vector.load %arg15[%c1_111, %c0_112, %c0_113] : memref<2x32x128xbf16, #tpu.memory_space<vmem>>, vector<1x32x128xbf16>
    %250 = vector.shape_cast %249 : vector<1x32x128xbf16> to vector<32x128xbf16>
    %251 = arith.truncf %248 : vector<20x32xf32> to vector<20x32xbf16>
    %cst_114 = arith.constant dense<0.000000e+00> : vector<20x128xf32>
    %252 = tpu.matmul %251, %250, %cst_114 {dimension_numbers = #tpu.dot_dimension_numbers<[1], [0], [0], [1], [0, 0, 1, 1], [], []>} : vector<20x32xbf16>, vector<32x128xbf16>, vector<20x128xf32> -> vector<20x128xf32>
    %c1_115 = arith.constant 1 : index
    %c0_116 = arith.constant 0 : index
    %c0_117 = arith.constant 0 : index
    %253 = vector.load %arg16[%c1_115, %c0_116, %c0_117] : memref<2x1x128xf32, #tpu.memory_space<vmem>>, vector<1x1x128xf32>
    %254 = vector.shape_cast %253 : vector<1x1x128xf32> to vector<1x128xf32>
    %255 = vector.broadcast %254 : vector<1x128xf32> to vector<20x128xf32>
    %256 = arith.addf %252, %255 : vector<20x128xf32>
    %cst_118 = arith.constant 1.702000e+00 : f32
    %257 = vector.broadcast %cst_118 : f32 to vector<20x128xf32>
    %258 = arith.mulf %257, %256 : vector<20x128xf32>
    %259 = arith.negf %258 : vector<20x128xf32>
    %260 = math.exp %259 : vector<20x128xf32>
    %cst_119 = arith.constant 1.000000e+00 : f32
    %261 = vector.broadcast %cst_119 : f32 to vector<20x128xf32>
    %262 = arith.addf %261, %260 : vector<20x128xf32>
    %263 = arith.divf %261, %262 : vector<20x128xf32>
    %264 = arith.mulf %256, %263 : vector<20x128xf32>
    %c1_120 = arith.constant 1 : index
    %c0_121 = arith.constant 0 : index
    %c0_122 = arith.constant 0 : index
    %265 = vector.load %arg17[%c1_120, %c0_121, %c0_122] : memref<2x128x32xbf16, #tpu.memory_space<vmem>>, vector<1x128x32xbf16>
    %266 = vector.shape_cast %265 : vector<1x128x32xbf16> to vector<128x32xbf16>
    %267 = arith.truncf %264 : vector<20x128xf32> to vector<20x128xbf16>
    %cst_123 = arith.constant dense<0.000000e+00> : vector<20x32xf32>
    %268 = tpu.matmul %267, %266, %cst_123 {dimension_numbers = #tpu.dot_dimension_numbers<[1], [0], [0], [1], [0, 0, 1, 1], [], []>} : vector<20x128xbf16>, vector<128x32xbf16>, vector<20x32xf32> -> vector<20x32xf32>
    %269 = arith.addf %222, %268 : vector<20x32xf32>
    %c1_124 = arith.constant 1 : index
    %c0_125 = arith.constant 0 : index
    %c0_126 = arith.constant 0 : index
    %270 = vector.load %arg18[%c1_124, %c0_125, %c0_126] : memref<2x1x32xf32, #tpu.memory_space<vmem>>, vector<1x1x32xf32>
    %271 = vector.shape_cast %270 : vector<1x1x32xf32> to vector<1x32xf32>
    %272 = vector.broadcast %271 : vector<1x32xf32> to vector<20x32xf32>
    %273 = arith.addf %269, %272 : vector<20x32xf32>
    %c0_127 = arith.constant 0 : index
    %c0_128 = arith.constant 0 : index
    %274 = vector.load %arg3[%c0_127, %c0_128] : memref<2x20xbf16, #tpu.memory_space<vmem>>, vector<2x20xbf16>
    %275 = arith.truncf %273 : vector<20x32xf32> to vector<20x32xbf16>
    %cst_129 = arith.constant dense<0.000000e+00> : vector<2x32xf32>
    %276 = tpu.matmul %274, %275, %cst_129 {dimension_numbers = #tpu.dot_dimension_numbers<[1], [0], [0], [1], [0, 0, 1, 1], [], []>} : vector<2x20xbf16>, vector<20x32xbf16>, vector<2x32xf32> -> vector<2x32xf32>
    %c0_130 = arith.constant 0 : index
    %c0_131 = arith.constant 0 : index
    %277 = vector.load %arg19[%c0_130, %c0_131] : memref<32x512xbf16, #tpu.memory_space<vmem>>, vector<32x512xbf16>
    %278 = arith.truncf %276 : vector<2x32xf32> to vector<2x32xbf16>
    %cst_132 = arith.constant dense<0.000000e+00> : vector<2x512xf32>
    %279 = tpu.matmul %278, %277, %cst_132 {dimension_numbers = #tpu.dot_dimension_numbers<[1], [0], [0], [1], [0, 0, 1, 1], [], []>} : vector<2x32xbf16>, vector<32x512xbf16>, vector<2x512xf32> -> vector<2x512xf32>
    %c0_133 = arith.constant 0 : index
    %c0_134 = arith.constant 0 : index
    %280 = vector.load %arg20[%c0_133, %c0_134] : memref<1x512xf32, #tpu.memory_space<vmem>>, vector<1x512xf32>
    %281 = vector.broadcast %280 : vector<1x512xf32> to vector<2x512xf32>
    %282 = arith.addf %279, %281 : vector<2x512xf32>
    %cst_135 = arith.constant 0.000000e+00 : f32
    %283 = vector.broadcast %cst_135 : f32 to vector<2x512xf32>
    %284 = arith.maximumf %282, %283 : vector<2x512xf32>
    %c0_136 = arith.constant 0 : index
    %c0_137 = arith.constant 0 : index
    %285 = vector.load %arg21[%c0_136, %c0_137] : memref<512x6xbf16, #tpu.memory_space<vmem>>, vector<512x6xbf16>
    %286 = arith.truncf %284 : vector<2x512xf32> to vector<2x512xbf16>
    %cst_138 = arith.constant dense<0.000000e+00> : vector<2x6xf32>
    %287 = tpu.matmul %286, %285, %cst_138 {dimension_numbers = #tpu.dot_dimension_numbers<[1], [0], [0], [1], [0, 0, 1, 1], [], []>} : vector<2x512xbf16>, vector<512x6xbf16>, vector<2x6xf32> -> vector<2x6xf32>
    %c0_139 = arith.constant 0 : index
    %c0_140 = arith.constant 0 : index
    %288 = vector.load %arg22[%c0_139, %c0_140] : memref<1x6xf32, #tpu.memory_space<vmem>>, vector<1x6xf32>
    %289 = vector.broadcast %288 : vector<1x6xf32> to vector<2x6xf32>
    %290 = arith.addf %287, %289 : vector<2x6xf32>
    %c0_141 = arith.constant 0 : index
    %c0_142 = arith.constant 0 : index
    %291 = vector.load %arg23[%c0_141, %c0_142] : memref<2x6xf32, #tpu.memory_space<vmem>>, vector<2x6xf32>
    tpu.vector_store %arg23[%c0_141, %c0_142], %290 {strides = array<i32>} : memref<2x6xf32, #tpu.memory_space<vmem>>, vector<2x6xf32>,
    return
  }
}

</mosaic_0001>

<bundles_post_ra>
// kernel: tile.7
= control target key start
LH: loop header
LB: loop body
LE: loop exit
PB: predicated region body
PF: predicated region fallthrough
CT: control target
= control target key end

     0   :  { %vm3_vm0 = vcmask 261120   ;;  %s60_s0 = inlined_call_operand.vmem [shape: f32[4,5,32], index: 0, kind: input, shape index: {}]   ;;  %s61_s1 = inlined_call_operand.vmem [shape: f32[20,32], index: 1, kind: output, shape index: {}]  }
   0x1   :  { %v2_v0 = vld [vmem:[%s60_s0] sm:$0x1f]   ;;  %v20_v1 = vld [vmem:[%s60_s0 + $0x8] sm:$0x1f]   ;;  %v22_v2 = vld [vmem:[%s60_s0 + $0x10] sm:$0x1f]  }
   0x2   :  { %4 = vst.msk [vmem:[%s61_s1] sm:$0x1f] %vm3_vm0, %v2_v0   ;;  %21 = vst.msk [vmem:[%s61_s1 + $0x5] sm:$0x1f] %vm3_vm0, %v20_v1   ;;  %v24_v3 = vld [vmem:[%s60_s0 + $0x18] sm:$0x1f]  }
   0x3   :  { %23 = vst.msk [vmem:[%s61_s1 + $0xa] sm:$0x1f] %vm3_vm0, %v22_v2   ;;  %25 = vst.msk [vmem:[%s61_s1 + $0xf] sm:$0x1f] %vm3_vm0, %v24_v3  }

// kernel: _lambda_.1
= control target key start
LH: loop header
LB: loop body
LE: loop exit
PB: predicated region body
PF: predicated region fallthrough
CT: control target
= control target key end

     0   :  { %s4565_s0 = inlined_call_operand.vmem [shape: bf16[20,768], index: 0, kind: input, shape index: {}]   ;;  %s4566_s1 = inlined_call_operand.vmem [shape: f32[20,32], index: 1, kind: input, shape index: {}]   ;;  %s4567_s2 = inlined_call_operand.vmem [shape: f32[40,40], index: 2, kind: input, shape index: {}]   ;;  %s4568_s3 = inlined_call_operand.vmem [shape: bf16[2,20], index: 3, kind: input, shape index: {}]   ;;  %s4569_s4 = inlined_call_operand.vmem [shape: bf16[768,32], index: 4, kind: input, shape index: {}]   ;;  %s4570_s5 = inlined_call_operand.vmem [shape: f32[1,32], index: 5, kind: input, shape index: {}]   ;;  %s4571_s6 = inlined_call_operand.vmem [shape: f32[1,32], index: 6, kind: input, shape index: {}]   ;;  %s4572_s7 = inlined_call_operand.vmem [shape: f32[2,1,32], index: 7, kind: input, shape index: {}, may-alias: {7,13}]   ;;  %s4573_s8 = inlined_call_operand.vmem [shape: f32[2,1,32], index: 8, kind: input, shape index: {}, may-alias: {8,12,14,18}]   ;;  %s4574_s9 = inlined_call_operand.vmem [shape: bf16[2,32,96], index: 9, kind: input, shape index: {}]   ;;  %s4575_s10 = inlined_call_operand.vmem [shape: f32[2,1,96], index: 10, kind: input, shape index: {}]   ;;  %s4576_s11 = inlined_call_operand.vmem [shape: bf16[2,32,32], index: 11, kind: input, shape index: {}]   ;;  %s4577_s12 = inlined_call_operand.vmem [shape: f32[2,1,32], index: 12, kind: input, shape index: {}, may-alias: {8,12,14,18}]   ;;  %s4578_s13 = inlined_call_operand.vmem [shape: f32[2,1,32], index: 13, kind: input, shape index: {}, may-alias: {7,13}]   ;;  %s4579_s14 = inlined_call_operand.vmem [shape: f32[2,1,32], index: 14, kind: input, shape index: {}, may-alias: {8,12,14,18}]   ;;  %s4580_s15 = inlined_call_operand.vmem [shape: bf16[2,32,128], index: 15, kind: input, shape index: {}]   ;;  %s4581_s16 = inlined_call_operand.vmem [shape: f32[2,1,128], index: 16, kind: input, shape index: {}]   ;;  %s4582_s17 = inlined_call_operand.vmem [shape: bf16[2,128,32], index: 17, kind: input, shape index: {}]   ;;  %s4583_s18 = inlined_call_operand.vmem [shape: f32[2,1,32], index: 18, kind: input, shape index: {}, may-alias: {8,12,14,18}]   ;;  %s4584_s19 = inlined_call_operand.vmem [shape: bf16[32,512], index: 19, kind: input, shape index: {}]   ;;  %s4585_s20 = inlined_call_operand.vmem [shape: f32[1,512], index: 20, kind: input, shape index: {}]   ;;  %s4586_s21 = inlined_call_operand.vmem [shape: bf16[512,6], index: 21, kind: input, shape index: {}]   ;;  %s4587_s22 = inlined_call_operand.vmem [shape: f32[1,6], index: 22, kind: input, shape index: {}]   ;;  %s4588_s23 = inlined_call_operand.hbm [shape: f32[2,6], index: 23, kind: output, shape index: {}]  }
   0x1   :  { %4594 = sst [smem:[#allocation5_spill]] %s4565_s0 }
   0x2   :  { %4595 = sst [smem:[#allocation6_spill]] %s4566_s1 }
   0x3   :  { %4596 = sst [smem:[#allocation7_spill]] %s4567_s2 }
   0x4   :  { %4597 = sst [smem:[#allocation8_spill]] %s4568_s3 }
   0x5   :  { %4598 = sst [smem:[#allocation9_spill]] %s4569_s4 }
   0x6   :  { %4599 = sst [smem:[#allocation10_spill]] %s4570_s5 }
   0x7   :  { %4600 = sst [smem:[#allocation11_spill]] %s4571_s6 }
   0x8   :  { %4601 = sst [smem:[#allocation12_spill]] %s4572_s7 }
   0x9   :  { %s4602_s24 = sld [smem:[#allocation9_spill]]  ;;  %s4603_s27 = sld [smem:[#allocation5_spill]] }
   0xf   :  { %v3445_v0 = vld [vmem:[%s4602_s24 + $0x40] sm:$0xff]   ;;  %v3449_v4 = vld [vmem:[%s4602_s24 + $0x48] sm:$0xff]   ;;  %v3453_v8 = vld [vmem:[%s4602_s24 + $0x50] sm:$0xff]  }
  0x10   :  { %v3446_v1 = vld [vmem:[%s4602_s24] sm:$0xff]   ;;  %3060 = vmatprep.subr.bf16.mxu0 %v3445_v0  ;;  %v3450_v5 = vld [vmem:[%s4602_s24 + $0x8] sm:$0xff]   ;;  %v3454_v9 = vld [vmem:[%s4602_s24 + $0x10] sm:$0xff]  }
  0x11   :  { %v3447_v2 = vld [vmem:[%s4602_s24 + $0xc0] sm:$0xff]   ;;  %3061 = vmatpush3.bf16.msra.mxu0 %v3446_v1  ;;  %v3451_v6 = vld [vmem:[%s4602_s24 + $0xc8] sm:$0xff]   ;;  %v3455_v10 = vld [vmem:[%s4602_s24 + $0xd0] sm:$0xff]  }
  0x12   :  { %v3448_v3 = vld [vmem:[%s4602_s24 + $0x80] sm:$0xff]   ;;  %3088 = vmatprep.subr.bf16.mxu1 %v3447_v2  ;;  %3062 = vmatprep.subr.bf16.mxu0 %v3449_v4  ;;  %v3452_v7 = vld [vmem:[%s4602_s24 + $0x88] sm:$0xff]   ;;  %v3456_v11 = vld [vmem:[%s4602_s24 + $0x90] sm:$0xff]  }
  0x13   :  { %3089 = vmatpush3.bf16.msra.mxu1 %v3448_v3  ;;  %v3457_v12 = vld [vmem:[%s4602_s24 + $0x58] sm:$0xff]   ;;  %v3461_v16 = vld [vmem:[%s4602_s24 + $0x60] sm:$0xff]   ;;  %v3465_v20 = vld [vmem:[%s4602_s24 + $0x68] sm:$0xff]  }
  0x14   :  { %3090 = vmatprep.subr.bf16.mxu1 %v3451_v6  ;;  %v3458_v13 = vld [vmem:[%s4602_s24 + $0x18] sm:$0xff]   ;;  %v3462_v17 = vld [vmem:[%s4602_s24 + $0x20] sm:$0xff]   ;;  %v3466_v21 = vld [vmem:[%s4602_s24 + $0x28] sm:$0xff]  }
  0x15   :  { %3063 = vmatpush3.bf16.msra.mxu0 %v3450_v5  ;;  %v3459_v14 = vld [vmem:[%s4602_s24 + $0xd8] sm:$0xff]   ;;  %v3463_v18 = vld [vmem:[%s4602_s24 + $0xe0] sm:$0xff]   ;;  %v3467_v22 = vld [vmem:[%s4602_s24 + $0xe8] sm:$0xff]  }
  0x16   :  { %3064 = vmatprep.subr.bf16.mxu0 %v3453_v8  ;;  %v3460_v15 = vld [vmem:[%s4602_s24 + $0x98] sm:$0xff]   ;;  %v3464_v19 = vld [vmem:[%s4602_s24 + $0xa0] sm:$0xff]   ;;  %v3468_v23 = vld [vmem:[%s4602_s24 + $0xa8] sm:$0xff]  }
  0x17   :  { %3091 = vmatpush3.bf16.msra.mxu1 %v3452_v7  ;;  %v3469_v24 = vld [vmem:[%s4602_s24 + $0x70] sm:$0xff]   ;;  %v3473_v28 = vld [vmem:[%s4602_s24 + $0x78] sm:$0xff]   ;;  %v3480_v34 = vld [vmem:[%s4602_s24 + $0x140] sm:$0xff]  }
  0x18   :  { %3092 = vmatprep.subr.bf16.mxu1 %v3455_v10  ;;  %v3470_v25 = vld [vmem:[%s4602_s24 + $0x30] sm:$0xff]   ;;  %v3474_v29 = vld [vmem:[%s4602_s24 + $0x38] sm:$0xff]   ;;  %v3481_v35 = vld [vmem:[%s4603_s27 + $0x8] ss:$24 sps:$4 sm:$0xff]  }
  0x19   :  { %3065 = vmatpush3.bf16.msra.mxu0 %v3454_v9  ;;  %v3471_v26 = vld [vmem:[%s4602_s24 + $0xf0] sm:$0xff]   ;;  %v3475_v30 = vld [vmem:[%s4602_s24 + $0xf8] sm:$0xff]   ;;  %v3483_v36 = vld [vmem:[%s4603_s27 + $0xc] ss:$24 sps:$4 sm:$0xff]  }
  0x1a   :  { %3066 = vmatprep.subr.bf16.mxu0 %v3457_v12  ;;  %v3472_v27 = vld [vmem:[%s4602_s24 + $0xb0] sm:$0xff]   ;;  %v3476_v31 = vld [vmem:[%s4603_s27] ss:$24 sps:$4 sm:$0xff]   ;;  %v3478_v32 = vld [vmem:[%s4603_s27 + $0x4] ss:$24 sps:$4 sm:$0xff]   ;;  %603 = vmatprep.mubr.bf16.mxu1 %v3483_v36 }
  0x1b   :  { %3093 = vmatpush3.bf16.msra.mxu1 %v3456_v11  ;;  %v3479_v33 = vld [vmem:[%s4602_s24 + $0xb8] sm:$0xff]   ;;  %555 = vmatprep.mubr.bf16.mxu0 %v3478_v32  ;;  %v3484_v37 = vld [vmem:[%s4602_s24 + $0x100] sm:$0xff]   ;;  %v3485_v38 = vld [vmem:[%s4602_s24 + $0x148] sm:$0xff]  }
  0x1c   :  { %3094 = vmatprep.subr.bf16.mxu1 %v3459_v14  ;;  %v3486_v39 = vld [vmem:[%s4602_s24 + $0x108] sm:$0xff]   ;;  %v3487_v40 = vld [vmem:[%s4602_s24 + $0x150] sm:$0xff]   ;;  %v3489_v42 = vld [vmem:[%s4602_s24 + $0x158] sm:$0xff]  }
  0x1d   :  { %3067 = vmatpush3.bf16.msra.mxu0 %v3458_v13  ;;  %v3488_v41 = vld [vmem:[%s4602_s24 + $0x110] sm:$0xff]   ;;  %v3490_v44 = vld [vmem:[%s4602_s24 + $0x118] sm:$0xff]   ;;  %v3491_v47 = vld [vmem:[%s4602_s24 + $0x160] sm:$0xff]  }
  0x1e   :  { %3068 = vmatprep.subr.bf16.mxu0 %v3461_v16  ;;  %v82_v43 = vld [vmem:[%s4603_s27 + $0x30] sm:$0x33]  ;;  %v83_v48 = vld [vmem:[%s4603_s27 + $0x38] sm:$0x33]  ;;  %v3492_v51 = vld [vmem:[%s4602_s24 + $0x120] sm:$0xff]  }
  0x1f   :  { %3095 = vmatpush3.bf16.msra.mxu1 %v3460_v15  ;;  %v2851_v45 = vcombine.high %v82_v43, %v82_v43  ;;  %v2850_v46 = vcombine.low %v82_v43, %v82_v43  ;;  %v2853_v49 = vcombine.high %v83_v48, %v83_v48  ;;  %v2852_v50 = vcombine.low %v83_v48, %v83_v48  ;;  %v3494_v52 = vld [vmem:[%s4602_s24 + $0x168] sm:$0xff]   ;;  %v3498_v55 = vld [vmem:[%s4602_s24 + $0x170] sm:$0xff]   ;;  %v3501_v57 = vld [vmem:[%s4602_s24 + $0x178] sm:$0xff]  }
  0x20   :  { %3096 = vmatprep.subr.bf16.mxu1 %v3463_v18  ;;  %v3496_v53 = vld [vmem:[%s4602_s24 + $0x128] sm:$0xff]   ;;  %v3500_v56 = vld [vmem:[%s4602_s24 + $0x130] sm:$0xff]   ;;  %v3502_v58 = vld [vmem:[%s4602_s24 + $0x138] sm:$0xff]  }
  0x21   :  { %3069 = vmatpush3.bf16.msra.mxu0 %v3462_v17  ;;  %v3505_v54 = vld [vmem:[%s4603_s27 + $0x14] ss:$24 sps:$4 sm:$0xff]   ;;  %v84_v59 = vld [vmem:[%s4603_s27 + $0x40] sm:$0x33]  ;;  %v3503_v60 = vld [vmem:[%s4603_s27 + $0x10] ss:$24 sps:$4 sm:$0xff]  }
  0x22   :  { %3070 = vmatprep.subr.bf16.mxu0 %v3465_v20  ;;  %v2855_v61 = vcombine.high %v84_v59, %v84_v59  ;;  %v2854_v62 = vcombine.low %v84_v59, %v84_v59 }
  0x23   :  { %3097 = vmatpush3.bf16.msra.mxu1 %v3464_v19 }
  0x24   :  { %3098 = vmatprep.subr.bf16.mxu1 %v3467_v22 }
  0x25   :  { %3071 = vmatpush3.bf16.msra.mxu0 %v3466_v21 }
  0x26   :  { %3072 = vmatprep.subr.bf16.mxu0 %v3469_v24 }
  0x27   :  { %3099 = vmatpush3.bf16.msra.mxu1 %v3468_v23 }
  0x28   :  { %3100 = vmatprep.subr.bf16.mxu1 %v3471_v26 }
  0x29   :  { %3073 = vmatpush3.bf16.msra.mxu0 %v3470_v25 }
  0x2a   :  { %3074 = vmatprep.subr.bf16.mxu0 %v3473_v28 }
  0x2b   :  { %3101 = vmatpush3.bf16.msra.mxu1 %v3472_v27 }
  0x2c   :  { %3102 = vmatprep.subr.bf16.mxu1 %v3475_v30 }
  0x2d   :  { %3075 = vmatpush3.bf16.msra.mxu0 %v3474_v29 }
  0x2e   :  { %3116 = vmatprep.subr.bf16.mxu0 %v3480_v34 }
  0x2f   :  { %3103 = vmatpush3.bf16.msra.mxu1 %v3479_v33 }
  0x30   :  { %556 = vmatmul.mubr.bf16.vlgmr.msra.gmra.mrb[0].mxu0 %v3476_v31 }
  0x31   :  { %3117 = vmatpush3.bf16.msra.mxu0 %v3484_v37  ;;  %563 = vmatprep.mubr.bf16.mxu0 %v2851_v45 }
  0x32   :  { %604 = vmatmul.mubr.bf16.vlgmr.msra.gmra.mrb[0].mxu1 %v3481_v35  ;;  %3118 = vmatprep.subr.bf16.mxu0 %v3485_v38 }
  0x33   :  { %611 = vmatprep.mubr.bf16.mxu1 %v2853_v49 }
  0x35   :  { %3119 = vmatpush3.bf16.msra.mxu0 %v3486_v39 }
  0x36   :  { %3120 = vmatprep.subr.bf16.mxu0 %v3487_v40 }
  0x38   :  { %564 = vmatmul.mubr.bf16.gmra.mrb[4].mxu0 %v2850_v46 }
  0x39   :  { %3121 = vmatpush3.bf16.msra.mxu0 %v3488_v41  ;;  %651 = vmatprep.mubr.bf16.mxu0 %v3505_v54 }
  0x3a   :  { %3122 = vmatprep.subr.bf16.mxu0 %v3489_v42  ;;  %612 = vmatmul.mubr.bf16.gmra.mrb[4].mxu1 %v2852_v50 }
  0x3d   :  { %3123 = vmatpush3.bf16.msra.mxu0 %v3490_v44 }
  0x3e   :  { %3124 = vmatprep.subr.bf16.mxu0 %v3491_v47 }
  0x41   :  { %3125 = vmatpush3.bf16.msra.mxu0 %v3492_v51 }
  0x42   :  { %3126 = vmatprep.subr.bf16.mxu0 %v3494_v52 }
  0x45   :  { %3127 = vmatpush3.bf16.msra.mxu0 %v3496_v53 }
  0x46   :  { %3128 = vmatprep.subr.bf16.mxu0 %v3498_v55 }
  0x49   :  { %3129 = vmatpush3.bf16.msra.mxu0 %v3500_v56 }
  0x4a   :  { %3130 = vmatprep.subr.bf16.mxu0 %v3501_v57 }
  0x4d   :  { %3131 = vmatpush3.bf16.msra.mxu0 %v3502_v58 }
  0x50   :  { %652 = vmatmul.mubr.bf16.vlgmr.msra.gmra.mrb[8].mxu0 %v3503_v60 }
  0x51   :  { %659 = vmatprep.mubr.bf16.mxu0 %v2855_v61 }
  0x58   :  { %660 = vmatmul.mubr.bf16.gmra.mrb[12].mxu0 %v2854_v62 }
  0x59   :  { %28 = vsyncpa [#allocation3], 0  ;;  %s4604_s6 = sld [smem:[#allocation6_spill]]  ;;  %vm669_vm0 = vcmask 261120   ;;  %vm676_vm1 = vcmask 257024   ;;  %s4605_s4 = sld [smem:[#allocation10_spill]] }
  0x5a   :  { %s4606_s5 = sld [smem:[#allocation11_spill]]  ;;  %s4607_s28 = sld [smem:[#allocation12_spill]]  ;;  %vm876_vm2 = vcmask 1041408   ;;  %vm3701_vm3 = vmmov 0   ;;  %vm895_vm4 = vcmask 130048   ;;  %vm969_vm5 = vcmask 326656  }
  0x5b   :  { %s3700_s30 = smov 96   ;;  %s4608_s1 = sld [smem:[#allocation7_spill]]  ;;  %vm1045_vm6 = vcmask 1043456   ;;  %vm2274_vm7 = vcmask 162816   ;;  %vm2828_vm8 = vcmask 41984  }
  0x5c   :  { %s3702_s0 = smov 64   ;;  %s3703_s2 = smov 16  }
  0x5d   :  { %s3705_s7 = smov [#allocation2]  }
  0x5f   :  { %v181_v0 = vld [vmem:[%s4604_s6] sm:$0xff]  ;;  %v182_v5 = vld [vmem:[%s4604_s6 + $0x8] sm:$0xff]  ;;  %v183_v18 = vld [vmem:[%s4604_s6 + $0x10] sm:$0xf]  ;;  %s4609_s6 = sld [smem:[#allocation8_spill]] }
 0x103   :  { %v3076_v63 = vpop.f32.mrb[0].mxu0 }
 0x104   :  { %v3077_v1 = vpop.f32.mrb[1].mxu0 }
 0x105   :  { %v3078_v2 = vadd.f32 %v3077_v1, %v3076_v63  ;;  %v3079_v3 = vpop.f32.mrb[2].mxu0  ;;  %v3104_v4 = vpop.f32.mrb[0].mxu1 }
 0x106   :  { %v3080_v6 = vpop.f32.mrb[3].mxu0  ;;  %v3105_v9 = vpop.f32.mrb[1].mxu1 }
 0x107   :  { %v558_v7 = vadd.f32 %v3078_v2, %v181_v0  ;;  %v3081_v8 = vadd.f32 %v3080_v6, %v3079_v3  ;;  %v3106_v10 = vadd.f32 %v3105_v9, %v3104_v4  ;;  %v3107_v11 = vpop.f32.mrb[2].mxu1 }
 0x108   :  { %v3108_v13 = vpop.f32.mrb[3].mxu1 }
 0x109   :  { %v561_v12 = vadd.f32 %v3081_v8, %v182_v5  ;;  %v606_v14 = vadd.f32 %v3106_v10, %v558_v7  ;;  %v3109_v15 = vadd.f32 %v3108_v13, %v3107_v11  ;;  %v2904_v8 = vld [vmem:[%s4605_s4] ss:$0 sm:$0xff]  ;;  %s3699_s4 = smov 112  }
 0x10a   :  { %v2905_v10 = vld [vmem:[%s4606_s5] ss:$0 sm:$0xff] }
 0x10b   :  { %v609_v16 = vadd.f32 %v3109_v15, %v561_v12  ;;  %v3082_v17 = vpop.f32.mrb[4].mxu0 }
 0x10c   :  { %v3083_v19 = vpop.f32.mrb[5].mxu0 }
 0x10d   :  { %v3084_v20 = vadd.f32 %v3083_v19, %v3082_v17  ;;  %v3085_v21 = vpop.f32.mrb[6].mxu0  ;;  %v3110_v23 = vpop.f32.mrb[4].mxu1 }
 0x10e   :  { %v3086_v22 = vpop.f32.mrb[7].mxu0  ;;  %v3111_v25 = vpop.f32.mrb[5].mxu1 }
 0x10f   :  { %v566_v24 = vadd.f32 %v3084_v20, %v183_v18  ;;  %v3112_v26 = vadd.f32 %v3111_v25, %v3110_v23  ;;  %v3113_v27 = vpop.f32.mrb[6].mxu1 }
 0x110   :  { %v3114_v28 = vpop.f32.mrb[7].mxu1 }
 0x111   :  { %v614_v29 = vadd.f32 %v3112_v26, %v566_v24 }
 0x123   :  { %v3132_v30 = vpop.f32.mrb[8].mxu0 }
 0x124   :  { %v3133_v31 = vpop.f32.mrb[9].mxu0 }
 0x125   :  { %v3134_v32 = vadd.f32 %v3133_v31, %v3132_v30  ;;  %v3135_v33 = vpop.f32.mrb[10].mxu0 }
 0x126   :  { %v3136_v34 = vpop.f32.mrb[11].mxu0 }
 0x127   :  { %v3137_v35 = vadd.f32 %v3136_v34, %v3135_v33  ;;  %v654_v36 = vadd.f32 %v3134_v32, %v606_v14 }
 0x129   :  { %v670_v37 = vsel %vm669_vm0, %v654_v36, 0.0  ;;  %v657_v38 = vadd.f32 %v3137_v35, %v609_v16 }
 0x12a   :  { %671 = vadd.xlane.f32.xlu0 %v670_v37 }
 0x12b   :  { %v3138_v39 = vpop.f32.mrb[12].mxu0  ;;  %v673_v43 = vsel %vm669_vm0, %v657_v38, 0.0 }
 0x12c   :  { %v3139_v40 = vpop.f32.mrb[13].mxu0 }
 0x12d   :  { %v3140_v41 = vadd.f32 %v3139_v40, %v3138_v39  ;;  %v3141_v42 = vpop.f32.mrb[14].mxu0  ;;  %v3508_v39 = vld [vmem:[%s4574_s9] sm:$0xff]   ;;  %v3509_v40 = vld [vmem:[%s4574_s9 + $0x8] sm:$0xff]  }
 0x12e   :  { %v3142_v44 = vpop.f32.mrb[15].mxu0  ;;  %674 = vadd.xlane.f32.xlu0 %v673_v43  ;;  %3259 = vmatprep.subr.bf16.mxu1 %v3508_v39 }
 0x12f   :  { %v662_v45 = vadd.f32 %v3140_v41, %v614_v29  ;;  %3260 = vmatpush3.bf16.msra.mxu1 %v3508_v39 }
 0x130   :  { %3261 = vmatprep.subr.bf16.mxu1 %v3509_v40 }
 0x131   :  { %v677_v46 = vsel %vm676_vm1, %v662_v45, 0.0 }
 0x132   :  { %678 = vadd.xlane.f32.xlu1 %v677_v46 }
 0x133   :  { %3262 = vmatpush3.bf16.msra.mxu1 %v3509_v40  ;;  %v4113_v40 = vld [vmem:[%s4608_s1 + $0x18] sm:$0xff] }
 0x1b7   :  { %v672_v47 = vpop.xlane.xlu0 %671 }
 0x1b8   :  { %v681_v48 = vmul.f32 0.03125, %v672_v47 }
 0x1ba   :  { %v684_v49 = vsub.f32 %v654_v36, %v681_v48 }
 0x1bb   :  { %v675_v50 = vpop.xlane.xlu0 %674 }
 0x1bc   :  { %v682_v51 = vmul.f32 0.03125, %v675_v50  ;;  %v687_v52 = vmul.f32 %v684_v49, %v684_v49 }
 0x1be   :  { %v685_v53 = vsub.f32 %v657_v38, %v682_v51  ;;  %v690_v54 = vsel %vm669_vm0, %v687_v52, 0.0  ;;  %v2906_v52 = vld [vmem:[%s4607_s28] ss:$0 sm:$0xff] }
 0x1bf   :  { %v679_v55 = vpop.xlane.xlu1 %678  ;;  %691 = vadd.xlane.f32.xlu1 %v690_v54 }
 0x1c0   :  { %v683_v56 = vmul.f32 0.03125, %v679_v55  ;;  %v688_v57 = vmul.f32 %v685_v53, %v685_v53 }
 0x1c2   :  { %v686_v58 = vsub.f32 %v662_v45, %v683_v56  ;;  %v693_v59 = vsel %vm669_vm0, %v688_v57, 0.0  ;;  %v2907_v56 = vld [vmem:[%s4573_s8] ss:$0 sm:$0xff] }
 0x1c3   :  { %694 = vadd.xlane.f32.xlu0 %v693_v59 }
 0x1c4   :  { %v689_v60 = vmul.f32 %v686_v58, %v686_v58 }
 0x1c6   :  { %v696_v61 = vsel %vm676_vm1, %v689_v60, 0.0 }
 0x1c7   :  { %697 = vadd.xlane.f32.xlu1 %v696_v61 }
 0x24c   :  { %v692_v62 = vpop.xlane.xlu1 %691 }
 0x24d   :  { %v699_v63 = vmul.f32 0.03125, %v692_v62 }
 0x24f   :  { %v702_v0 = vadd.f32 1e-05, %v699_v63 }
 0x250   :  { %v695_v1 = vpop.xlane.xlu0 %694 }
 0x251   :  { %3580 = vrsqrt.f32 %v702_v0  ;;  %v700_v2 = vmul.f32 0.03125, %v695_v1 }
 0x253   :  { %v703_v3 = vadd.f32 1e-05, %v700_v2  ;;  %v2908_v2 = vld [vmem:[%s4575_s10] ss:$0 sm:$0xff] }
 0x254   :  { %v698_v4 = vpop.xlane.xlu1 %697 }
 0x255   :  { %3582 = vrsqrt.f32 %v703_v3  ;;  %v701_v5 = vmul.f32 0.03125, %v698_v4 }
 0x257   :  { %v704_v6 = vadd.f32 1e-05, %v701_v5 }
 0x259   :  { %3584 = vrsqrt.f32 %v704_v6 }
 0x25b   :  { %v3581_v7 = vpop.eup %3580 }
 0x25c   :  { %v708_v9 = vmul.f32 %v3581_v7, %v684_v49  ;;  %v3698_v7 = vmov 0.0  }
 0x25d   :  { %3267 = vmatprep.subr.bf16.mxu1 %v3698_v7  ;;  %3285 = vmatprep.subr.bf16.mxu0 %v3698_v7 }
 0x25e   :  { %v717_v11 = vmul.f32 %v2904_v8, %v708_v9  ;;  %3291 = vmatprep.mubr.msk.bf16.mxu0 %vm3701_vm3, %v3698_v7 }
 0x25f   :  { %v3583_v12 = vpop.eup %3582 }
 0x260   :  { %v4018_v13 = vadd.f32 %v2905_v10, %v717_v11  ;;  %v709_v14 = vmul.f32 %v3583_v12, %v685_v53 }
 0x262   :  { %v736_v15 = vsel %vm669_vm0, %v4018_v13, 0.0  ;;  %v718_v16 = vmul.f32 %v2904_v8, %v709_v14 }
 0x263   :  { %v3585_v17 = vpop.eup %3584  ;;  %737 = vadd.xlane.f32.xlu0 %v736_v15 }
 0x264   :  { %v4022_v18 = vadd.f32 %v2905_v10, %v718_v16  ;;  %v710_v19 = vmul.f32 %v3585_v17, %v686_v58 }
 0x266   :  { %v739_v20 = vsel %vm669_vm0, %v4022_v18, 0.0  ;;  %v719_v21 = vmul.f32 %v2904_v8, %v710_v19 }
 0x267   :  { %740 = vadd.xlane.f32.xlu1 %v739_v20 }
 0x268   :  { %v4026_v22 = vadd.f32 %v2905_v10, %v719_v21 }
 0x26a   :  { %v742_v23 = vsel %vm676_vm1, %v4026_v22, 0.0 }
 0x26b   :  { %743 = vadd.xlane.f32.xlu0 %v742_v23 }
 0x2f0   :  { %v738_v24 = vpop.xlane.xlu0 %737 }
 0x2f1   :  { %v745_v25 = vmul.f32 0.03125, %v738_v24 }
 0x2f3   :  { %v748_v26 = vsub.f32 %v4018_v13, %v745_v25 }
 0x2f4   :  { %v741_v27 = vpop.xlane.xlu1 %740 }
 0x2f5   :  { %v746_v28 = vmul.f32 0.03125, %v741_v27  ;;  %v751_v29 = vmul.f32 %v748_v26, %v748_v26 }
 0x2f7   :  { %v749_v30 = vsub.f32 %v4022_v18, %v746_v28  ;;  %v754_v31 = vsel %vm669_vm0, %v751_v29, 0.0  ;;  %v4094_v28 = vld [vmem:[%s4608_s1] sm:$0xff] }
 0x2f8   :  { %755 = vadd.xlane.f32.xlu1 %v754_v31  ;;  %v744_v32 = vpop.xlane.xlu0 %743 }
 0x2f9   :  { %v747_v33 = vmul.f32 0.03125, %v744_v32  ;;  %v752_v34 = vmul.f32 %v749_v30, %v749_v30 }
 0x2fb   :  { %v750_v35 = vsub.f32 %v4026_v22, %v747_v33  ;;  %v757_v36 = vsel %vm669_vm0, %v752_v34, 0.0 }
 0x2fc   :  { %758 = vadd.xlane.f32.xlu0 %v757_v36 }
 0x2fd   :  { %v753_v37 = vmul.f32 %v750_v35, %v750_v35 }
 0x2ff   :  { %v760_v38 = vsel %vm676_vm1, %v753_v37, 0.0 }
 0x300   :  { %761 = vadd.xlane.f32.xlu1 %v760_v38  ;;  %v4108_v38 = vld [vmem:[%s4608_s1 + $0x10] sm:$0xff] }
 0x385   :  { %v756_v41 = vpop.xlane.xlu1 %755 }
 0x386   :  { %v763_v42 = vmul.f32 0.03125, %v756_v41 }
 0x388   :  { %v766_v43 = vadd.f32 1e-05, %v763_v42 }
 0x389   :  { %v759_v44 = vpop.xlane.xlu0 %758 }
 0x38a   :  { %3586 = vrsqrt.f32 %v766_v43  ;;  %v764_v45 = vmul.f32 0.03125, %v759_v44 }
 0x38c   :  { %v767_v46 = vadd.f32 1e-05, %v764_v45 }
 0x38d   :  { %v762_v47 = vpop.xlane.xlu1 %761 }
 0x38e   :  { %3588 = vrsqrt.f32 %v767_v46  ;;  %v765_v48 = vmul.f32 0.03125, %v762_v47  ;;  %v4121_v47 = vld [vmem:[%s4608_s1 + $0x20] sm:$0xff] }
 0x390   :  { %v768_v49 = vadd.f32 1e-05, %v765_v48 }
 0x392   :  { %3590 = vrsqrt.f32 %v768_v49 }
 0x394   :  { %v3587_v50 = vpop.eup %3586 }
 0x395   :  { %v772_v51 = vmul.f32 %v3587_v50, %v748_v26 }
 0x397   :  { %v781_v55 = vmul.f32 %v2906_v52, %v772_v51 }
 0x398   :  { %v3589_v53 = vpop.eup %3588 }
 0x399   :  { %v773_v54 = vmul.f32 %v3589_v53, %v749_v30  ;;  %v790_v60 = vadd.f32 %v2907_v56, %v781_v55  ;;  %v4099_v30 = vld [vmem:[%s4608_s1 + $0x8] sm:$0xff] }
 0x39b   :  { %v782_v57 = vmul.f32 %v2906_v52, %v773_v54 }
 0x39c   :  { %v3591_v58 = vpop.eup %3590 }
 0x39d   :  { %v774_v59 = vmul.f32 %v3591_v58, %v750_v35  ;;  %v791_v61 = vadd.f32 %v2907_v56, %v782_v57 }
 0x39f   :  { %v783_v62 = vmul.f32 %v2906_v52, %v774_v59  ;;  %v797_v63 = vpack.c.bf16 %v791_v61, %v790_v60 }
 0x3a1   :  { %v792_v0 = vadd.f32 %v2907_v56, %v783_v62  ;;  %3263 = vmatprep.mubr.msk.bf16.mxu1 %vm669_vm0, %v797_v63 }
 0x3a3   :  { %v798_v1 = vpack.c.bf16 %v792_v0, %v792_v0 }
 0x3a5   :  { %3264 = vmatmul.mubr.msk.bf16.vlgmr.msra.gmra.mrb[8].mxu1 %vm669_vm0, %v798_v1 }
 0x3a6   :  { %3273 = vmatprep.mubr.msk.bf16.mxu1 %vm3701_vm3, %v3698_v7 }
 0x478   :  { %v3265_v3 = vpop.f32.mrb[8].mxu1 }
 0x479   :  { %v867_v4 = vadd.f32 %v3265_v3, %v2908_v2  ;;  %v858_v5 = vpop.f32.mrb[9].mxu1 }
 0x47a   :  { %v3266_v6 = vpop.f32.mrb[10].mxu1  ;;  %v859_v10 = vadd.f32 %v2908_v2, %v858_v5 }
 0x47b   :  { %v861_v8 = vpop.f32.mrb[11].mxu1  ;;  %v873_v9 = vpack.c.bf16 %v867_v4, %v867_v4 }
 0x47c   :  { %v862_v11 = vadd.f32 %v2908_v2, %v861_v8 }
 0x47d   :  { %v878_v14 = vrot.slane %v873_v9, 6 }
 0x47e   :  { %v4055_v12 = vpack.c.bf16 %v862_v11, %v859_v10 }
 0x480   :  { %v877_v15 = vrot.slane %v4055_v12, 6 }
 0x482   :  { %880 = vrot.lane.b32.xlu0 %v877_v15, %s3699_s4  ;;  %v879_v16 = vsel %vm876_vm2, %v877_v15, %v878_v14 }
 0x483   :  { %882 = vrot.lane.b32.xlu1 %v879_v16, %s3699_s4 }
 0x487   :  { %889 = vrot.lane.b32.xlu1 %v4055_v12, %s3700_s30 }
 0x4f4   :  { %v881_v17 = vpop.permute.xlu0 %880 }
 0x4f5   :  { %v4067_v19 = vpop.permute.xlu1 %882  ;;  %v4070_v20 = vsel %vm876_vm2, %v873_v9, %v881_v17 }
 0x4f6   :  { %891 = vrot.lane.b32.xlu1 %v4070_v20, %s3700_s30  ;;  %893 = vrot.lane.b32.xlu0 %v4067_v19, %s3700_s30 }
 0x4f9   :  { %v890_v21 = vpop.permute.xlu1 %889 }
 0x4fa   :  { %v905_v23 = vsel %vm895_vm4, %v890_v21, 0 }
 0x4fb   :  { %3268 = vmatpush3.bf16.xpose.msra.mxu1 %v905_v23 }
 0x4fc   :  { %3269 = vmatprep.subr.bf16.mxu1 %v3698_v7 }
 0x568   :  { %v892_v24 = vpop.permute.xlu1 %891  ;;  %v894_v26 = vpop.permute.xlu0 %893 }
 0x569   :  { %v908_v25 = vsel %vm895_vm4, %v892_v24, 0  ;;  %v911_v27 = vsel %vm895_vm4, %v894_v26, 0 }
 0x56a   :  { %3270 = vmatpush3.bf16.xpose.msra.mxu1 %v908_v25 }
 0x56b   :  { %3271 = vmatprep.subr.bf16.mxu1 %v3698_v7 }
 0x572   :  { %3272 = vmatpush3.bf16.xpose.msra.mxu1 %v911_v27 }
 0x579   :  { %3274 = vmatmul.mubr.msk.bf16.vlgmr.msra.gmra.mrb[12].mxu1 %vm895_vm4, %v4055_v12 }
 0x57a   :  { %3277 = vmatprep.mubr.msk.bf16.mxu1 %vm3701_vm3, %v3698_v7 }
 0x581   :  { %3278 = vmatmul.mubr.msk.bf16.gmra.mrb[16].mxu1 %vm895_vm4, %v4070_v20 }
 0x582   :  { %3281 = vmatprep.mubr.msk.bf16.mxu1 %vm3701_vm3, %v3698_v7 }
 0x589   :  { %3282 = vmatmul.mubr.msk.bf16.gmra.mrb[20].mxu1 %vm895_vm4, %v4067_v19 }
 0x64c   :  { %v947_v29 = vpop.f32.mrb[12].mxu1 }
 0x64d   :  { %v948_v31 = vadd.f32 %v947_v29, %v4094_v28  ;;  %v3275_v32 = vpop.f32.mrb[13].mxu1 }
 0x64e   :  { %v950_v33 = vpop.f32.mrb[14].mxu1 }
 0x64f   :  { %v951_v34 = vadd.f32 %v950_v33, %v4099_v30  ;;  %v3276_v35 = vpop.f32.mrb[15].mxu1  ;;  %v970_v36 = vsel %vm969_vm5, %v948_v31, -inf }
 0x650   :  { %971 = vmax.xlane.f32.xlu1 %v970_v36 }
 0x651   :  { %v973_v37 = vsel %vm969_vm5, %v951_v34, -inf }
 0x652   :  { %974 = vmax.xlane.f32.xlu0 %v973_v37 }
 0x654   :  { %v955_v39 = vpop.f32.mrb[16].mxu1 }
 0x655   :  { %v956_v41 = vadd.f32 %v955_v39, %v4108_v38  ;;  %v3279_v42 = vpop.f32.mrb[17].mxu1 }
 0x656   :  { %v958_v43 = vpop.f32.mrb[18].mxu1 }
 0x657   :  { %v959_v44 = vadd.f32 %v958_v43, %v4113_v40  ;;  %v3280_v45 = vpop.f32.mrb[19].mxu1  ;;  %v976_v46 = vsel %vm969_vm5, %v956_v41, -inf }
 0x658   :  { %977 = vmax.xlane.f32.xlu0 %v976_v46  ;;  %v3510_v46 = vld [vmem:[%s4576_s11] sm:$0xff]  }
 0x659   :  { %v979_v48 = vsel %vm969_vm5, %v959_v44, -inf  ;;  %3303 = vmatprep.subr.bf16.mxu1 %v3510_v46 }
 0x65a   :  { %3304 = vmatpush3.bf16.msra.mxu1 %v3510_v46  ;;  %v3512_v46 = vld [vmem:[%s4580_s15] sm:$0xff]  }
 0x65c   :  { %980 = vmax.xlane.f32.xlu0 %v979_v48  ;;  %v963_v49 = vpop.f32.mrb[20].mxu1  ;;  %v3511_v48 = vld [vmem:[%s4576_s11 + $0x8] sm:$0xff]  }
 0x65d   :  { %v964_v50 = vadd.f32 %v963_v49, %v4121_v47  ;;  %v3283_v51 = vpop.f32.mrb[21].mxu1  ;;  %3305 = vmatprep.subr.bf16.mxu1 %v3511_v48 }
 0x65e   :  { %v966_v52 = vpop.f32.mrb[22].mxu1  ;;  %3306 = vmatpush3.bf16.msra.mxu1 %v3511_v48  ;;  %v3513_v48 = vld [vmem:[%s4580_s15 + $0x8] sm:$0xff]  }
 0x65f   :  { %v3284_v53 = vpop.f32.mrb[23].mxu1  ;;  %v982_v54 = vsel %vm969_vm5, %v964_v50, -inf }
 0x660   :  { %983 = vmax.xlane.f32.xlu1 %v982_v54 }
 0x671   :  { %1028 = vrot.lane.b32.xlu1 %v4055_v12, %s3702_s0 }
 0x6dd   :  { %v972_v55 = vpop.xlane.xlu1 %971 }
 0x6de   :  { %v985_v56 = vsub.f32 %v948_v31, %v972_v55 }
 0x6df   :  { %v975_v57 = vpop.xlane.xlu0 %974 }
 0x6e0   :  { %v990_v58 = vmul.f32 1.442695, %v985_v56  ;;  %v986_v59 = vsub.f32 %v951_v34, %v975_v57 }
 0x6e2   :  { %3592 = vpow2.f32 %v990_v58  ;;  %v992_v60 = vmul.f32 1.442695, %v986_v59 }
 0x6e4   :  { %3594 = vpow2.f32 %v992_v60 }
 0x6e5   :  { %v978_v61 = vpop.xlane.xlu0 %977 }
 0x6e6   :  { %v987_v62 = vsub.f32 %v956_v41, %v978_v61 }
 0x6e8   :  { %v994_v63 = vmul.f32 1.442695, %v987_v62 }
 0x6e9   :  { %v981_v0 = vpop.xlane.xlu0 %980 }
 0x6ea   :  { %3596 = vpow2.f32 %v994_v63  ;;  %v988_v1 = vsub.f32 %v959_v44, %v981_v0 }
 0x6ec   :  { %v3593_v2 = vpop.eup %3592  ;;  %v996_v3 = vmul.f32 1.442695, %v988_v1 }
 0x6ed   :  { %v984_v4 = vpop.xlane.xlu1 %983  ;;  %v1000_v5 = vsel %vm969_vm5, %v3593_v2, 0.0 }
 0x6ee   :  { %v3595_v6 = vpop.eup %3594  ;;  %3598 = vpow2.f32 %v996_v3  ;;  %v989_v8 = vsub.f32 %v964_v50, %v984_v4  ;;  %1001 = vadd.xlane.f32.xlu0 %v1000_v5 }
 0x6ef   :  { %v1003_v9 = vsel %vm969_vm5, %v3595_v6, 0.0 }
 0x6f0   :  { %v998_v10 = vmul.f32 1.442695, %v989_v8  ;;  %1004 = vadd.xlane.f32.xlu1 %v1003_v9 }
 0x6f1   :  { %v1029_v11 = vpop.permute.xlu1 %1028 }
 0x6f2   :  { %3600 = vpow2.f32 %v998_v10  ;;  %3286 = vmatpush3.bf16.msra.mxu0 %v1029_v11 }
 0x6f3   :  { %3287 = vmatprep.subr.bf16.mxu0 %v3698_v7 }
 0x6f4   :  { %v3597_v12 = vpop.eup %3596 }
 0x6f5   :  { %v1006_v14 = vsel %vm969_vm5, %v3597_v12, 0.0 }
 0x6f6   :  { %1007 = vadd.xlane.f32.xlu0 %v1006_v14 }
 0x6f8   :  { %v3599_v15 = vpop.eup %3598 }
 0x6f9   :  { %v1009_v16 = vsel %vm969_vm5, %v3599_v15, 0.0 }
 0x6fa   :  { %1010 = vadd.xlane.f32.xlu1 %v1009_v16 }
 0x6fc   :  { %v3601_v17 = vpop.eup %3600 }
 0x6fd   :  { %v1012_v21 = vsel %vm969_vm5, %v3601_v17, 0.0 }
 0x6fe   :  { %1013 = vadd.xlane.f32.xlu0 %v1012_v21 }
 0x70b   :  { %1032 = vrot.lane.b32.xlu1 %v4067_v19, %s3702_s0 }
 0x714   :  { %1030 = vrot.lane.b32.xlu0 %v4070_v20, %s3702_s0 }
 0x77b   :  { %v1002_v24 = vpop.xlane.xlu0 %1001 }
 0x77d   :  { %v1005_v23 = vpop.xlane.xlu1 %1004 }
 0x77e   :  { %3602 = vrcp.f32 %v1005_v23 }
 0x77f   :  { %3604 = vrcp.f32 %v1002_v24 }
 0x783   :  { %v1008_v25 = vpop.xlane.xlu0 %1007 }
 0x787   :  { %v1011_v26 = vpop.xlane.xlu1 %1010 }
 0x788   :  { %3606 = vrcp.f32 %v1011_v26  ;;  %v3603_v29 = vpop.eup %3602 }
 0x789   :  { %3608 = vrcp.f32 %v1008_v25  ;;  %v3605_v32 = vpop.eup %3604  ;;  %v1021_v34 = vmul.f32 %v3603_v29, %v3595_v6 }
 0x78a   :  { %v1020_v19 = vmul.f32 %v3605_v32, %v3593_v2 }
 0x78b   :  { %v1014_v27 = vpop.xlane.xlu0 %1013  ;;  %v1033_v33 = vpop.permute.xlu1 %1032 }
 0x78c   :  { %v1047_v20 = vsel %vm1045_vm6, %v1033_v33, 0  ;;  %3610 = vrcp.f32 %v1014_v27  ;;  %v1025_v35 = vpack.c.bf16 %v1021_v34, %v1020_v19 }
 0x78f   :  { %v1031_v31 = vpop.permute.xlu0 %1030 }
 0x790   :  { %3288 = vmatpush3.bf16.msra.mxu0 %v1031_v31 }
 0x791   :  { %3289 = vmatprep.subr.bf16.mxu0 %v3698_v7 }
 0x792   :  { %v3607_v36 = vpop.eup %3606 }
 0x793   :  { %v3609_v37 = vpop.eup %3608  ;;  %v1023_v39 = vmul.f32 %v3607_v36, %v3599_v15  ;;  %v2923_v15 = vld [vmem:[%s4577_s12] ss:$0 sm:$0xff] }
 0x794   :  { %3290 = vmatpush3.bf16.msra.mxu0 %v1047_v20  ;;  %v1022_v41 = vmul.f32 %v3609_v37, %v3597_v12 }
 0x795   :  { %3311 = vmatprep.subr.bf16.mxu0 %v3512_v46 }
 0x796   :  { %v1026_v42 = vpack.c.bf16 %v1023_v39, %v1022_v41  ;;  %v3611_v43 = vpop.eup %3610 }
 0x797   :  { %3292 = vmatmul.mubr.msk.bf16.vlgmr.msra.gmra.mrb[16].mxu0 %vm969_vm5, %v1025_v35  ;;  %v1024_v44 = vmul.f32 %v3611_v43, %v3601_v17 }
 0x798   :  { %3295 = vmatprep.mubr.msk.bf16.mxu0 %vm3701_vm3, %v3698_v7  ;;  %3312 = vmatpush3.bf16.msra.mxu0 %v3512_v46 }
 0x799   :  { %v1027_v45 = vpack.c.bf16 %v1024_v44, %v1024_v44  ;;  %3313 = vmatprep.subr.bf16.mxu0 %v3513_v48 }
 0x79c   :  { %3314 = vmatpush3.bf16.msra.mxu0 %v3513_v48 }
 0x79f   :  { %3296 = vmatmul.mubr.msk.bf16.gmra.mrb[20].mxu0 %vm969_vm5, %v1026_v42 }
 0x7a0   :  { %3299 = vmatprep.mubr.msk.bf16.mxu0 %vm3701_vm3, %v3698_v7 }
 0x7a7   :  { %3300 = vmatmul.mubr.msk.bf16.gmra.mrb[24].mxu0 %vm969_vm5, %v1027_v45 }
 0x86a   :  { %v1083_v49 = vpop.f32.mrb[16].mxu0 }
 0x86b   :  { %v3293_v50 = vpop.f32.mrb[17].mxu0 }
 0x86c   :  { %v1086_v51 = vpop.f32.mrb[18].mxu0 }
 0x86d   :  { %v3294_v52 = vpop.f32.mrb[19].mxu0 }
 0x872   :  { %v1091_v53 = vpop.f32.mrb[20].mxu0 }
 0x873   :  { %v3297_v54 = vpop.f32.mrb[21].mxu0  ;;  %v1108_v56 = vrot.slane %v1091_v53, 4 }
 0x874   :  { %v1094_v55 = vpop.f32.mrb[22].mxu0 }
 0x875   :  { %v1109_v57 = vrot.slane %v1094_v55, 4  ;;  %v3298_v58 = vpop.f32.mrb[23].mxu0 }
 0x877   :  { %v1110_v59 = vsel %vm1045_vm6, %v1108_v56, %v1109_v57 }
 0x87a   :  { %v1099_v60 = vpop.f32.mrb[24].mxu0 }
 0x87b   :  { %v1111_v61 = vrot.slane %v1099_v60, 4  ;;  %v3301_v62 = vpop.f32.mrb[25].mxu0  ;;  %v2924_v60 = vld [vmem:[%s4578_s13] ss:$0 sm:$0xff] }
 0x87c   :  { %v1102_v63 = vpop.f32.mrb[26].mxu0 }
 0x87d   :  { %v3302_v0 = vpop.f32.mrb[27].mxu0  ;;  %v1112_v1 = vsel %vm1045_vm6, %v1109_v57, %v1111_v61 }
 0x87e   :  { %v3435_v2 = vpack.i.bf16 %v1112_v1, %v1110_v59 }
 0x880   :  { %3436 = vrot.lane.b32.xlu1 %v3435_v2, %s3703_s2  ;;  %v2925_v2 = vld [vmem:[%s4579_s14] ss:$0 sm:$0xff] }
 0x884   :  { %1117 = vrot.lane.b32.xlu1 %v1111_v61, %s3703_s2 }
 0x8f2   :  { %v3437_v3 = vpop.permute.xlu1 %3436 }
 0x8f3   :  { %v3439_v4 = vunpack.i.h.bf16 %v3437_v3  ;;  %v3438_v5 = vunpack.i.l.bf16 %v3437_v3 }
 0x8f5   :  { %v1123_v6 = vsel %vm895_vm4, %v1086_v51, %v3439_v4  ;;  %v1122_v8 = vsel %vm895_vm4, %v1083_v49, %v3438_v5 }
 0x8f6   :  { %v1129_v9 = vpack.c.bf16 %v1123_v6, %v1122_v8  ;;  %v1118_v10 = vpop.permute.xlu1 %1117 }
 0x8f7   :  { %v1124_v11 = vsel %vm895_vm4, %v1091_v53, %v1118_v10 }
 0x8f8   :  { %v1130_v12 = vpack.c.bf16 %v1124_v11, %v1124_v11  ;;  %3307 = vmatprep.mubr.msk.bf16.mxu1 %vm669_vm0, %v1129_v9  ;;  %v3514_v11 = vld [vmem:[%s4582_s17] sm:$0xff]  }
 0x8f9   :  { %3319 = vmatprep.subr.bf16.mxu1 %v3514_v11 }
 0x8fa   :  { %3308 = vmatmul.mubr.msk.bf16.vlgmr.msra.gmra.mrb[24].mxu1 %vm669_vm0, %v1130_v12  ;;  %v3515_v12 = vld [vmem:[%s4582_s17 + $0x8] sm:$0xff]  }
 0x8fb   :  { %3320 = vmatpush3.bf16.msra.mxu1 %v3514_v11 }
 0x8fc   :  { %3321 = vmatprep.subr.bf16.mxu1 %v3515_v12 }
 0x8ff   :  { %3322 = vmatpush3.bf16.msra.mxu1 %v3515_v12 }
 0x9cd   :  { %v3309_v14 = vpop.f32.mrb[24].mxu1 }
 0x9ce   :  { %v1183_v16 = vpop.f32.mrb[25].mxu1  ;;  %v1199_v17 = vadd.f32 %v3309_v14, %v4026_v22  ;;  %v3516_v14 = vld [vmem:[%s4582_s17 + $0x10] sm:$0xff]  }
 0x9cf   :  { %v1197_v21 = vadd.f32 %v1183_v16, %v4018_v13  ;;  %v3310_v23 = vpop.f32.mrb[26].mxu1  ;;  %3323 = vmatprep.subr.bf16.mxu1 %v3516_v14  ;;  %v3518_v16 = vld [vmem:[%s4582_s17 + $0x20] sm:$0xff]  }
 0x9d0   :  { %v1186_v24 = vpop.f32.mrb[27].mxu1  ;;  %v4170_v27 = vadd.f32 %v2923_v15, %v1199_v17  ;;  %3324 = vmatpush3.bf16.msra.mxu1 %v3516_v14  ;;  %v3519_v17 = vld [vmem:[%s4582_s17 + $0x28] sm:$0xff]   ;;  %v3521_v23 = vld [vmem:[%s4582_s17 + $0x38] sm:$0xff]  }
 0x9d1   :  { %v4167_v25 = vadd.f32 %v2923_v15, %v1197_v21  ;;  %v1198_v26 = vadd.f32 %v1186_v24, %v4022_v18  ;;  %v3520_v21 = vld [vmem:[%s4582_s17 + $0x30] sm:$0xff]   ;;  %v2926_v24 = vld [vmem:[%s4581_s16] ss:$0 sm:$0xff] }
 0x9d2   :  { %v1218_v13 = vsel %vm676_vm1, %v4170_v27, 0.0 }
 0x9d3   :  { %v4172_v29 = vadd.f32 %v2923_v15, %v1198_v26  ;;  %v1212_v31 = vsel %vm669_vm0, %v4167_v25, 0.0  ;;  %v3517_v15 = vld [vmem:[%s4582_s17 + $0x18] sm:$0xff]  }
 0x9d4   :  { %1213 = vadd.xlane.f32.xlu0 %v1212_v31  ;;  %3325 = vmatprep.subr.bf16.mxu1 %v3517_v15 }
 0x9d5   :  { %v1215_v32 = vsel %vm669_vm0, %v4172_v29, 0.0  ;;  %3326 = vmatpush3.bf16.msra.mxu1 %v3517_v15 }
 0x9d6   :  { %1216 = vadd.xlane.f32.xlu1 %v1215_v32  ;;  %3327 = vmatprep.subr.bf16.mxu1 %v3518_v16 }
 0x9d8   :  { %1219 = vadd.xlane.f32.xlu0 %v1218_v13 }
 0x9d9   :  { %3328 = vmatpush3.bf16.msra.mxu1 %v3518_v16 }
 0x9da   :  { %3329 = vmatprep.subr.bf16.mxu1 %v3519_v17 }
 0x9dd   :  { %3330 = vmatpush3.bf16.msra.mxu1 %v3519_v17 }
 0x9de   :  { %3331 = vmatprep.subr.bf16.mxu1 %v3520_v21 }
 0x9e1   :  { %3332 = vmatpush3.bf16.msra.mxu1 %v3520_v21 }
 0x9e2   :  { %3333 = vmatprep.subr.bf16.mxu1 %v3521_v23 }
 0x9e5   :  { %3334 = vmatpush3.bf16.msra.mxu1 %v3521_v23  ;;  %v3522_v23 = vld [vmem:[%s4574_s9 + $0x10] sm:$0xff]  }
 0x9e6   :  { %3365 = vmatprep.subr.bf16.mxu1 %v3698_v7  ;;  %3339 = vmatprep.subr.bf16.mxu0 %v3522_v23 }
 0xa61   :  { %v1214_v22 = vpop.xlane.xlu0 %1213 }
 0xa62   :  { %v1221_v33 = vmul.f32 0.03125, %v1214_v22 }
 0xa63   :  { %v1217_v34 = vpop.xlane.xlu1 %1216 }
 0xa64   :  { %v1224_v18 = vsub.f32 %v4167_v25, %v1221_v33  ;;  %v1222_v19 = vmul.f32 0.03125, %v1217_v34 }
 0xa65   :  { %v1220_v20 = vpop.xlane.xlu0 %1219 }
 0xa66   :  { %v1225_v35 = vsub.f32 %v4172_v29, %v1222_v19  ;;  %v1223_v36 = vmul.f32 0.03125, %v1220_v20  ;;  %v1227_v37 = vmul.f32 %v1224_v18, %v1224_v18 }
 0xa68   :  { %v1226_v39 = vsub.f32 %v4170_v27, %v1223_v36  ;;  %v1230_v41 = vsel %vm669_vm0, %v1227_v37, 0.0  ;;  %v1228_v42 = vmul.f32 %v1225_v35, %v1225_v35 }
 0xa69   :  { %1231 = vadd.xlane.f32.xlu0 %v1230_v41 }
 0xa6a   :  { %v1229_v43 = vmul.f32 %v1226_v39, %v1226_v39  ;;  %v1233_v45 = vsel %vm669_vm0, %v1228_v42, 0.0 }
 0xa6c   :  { %v1236_v44 = vsel %vm676_vm1, %v1229_v43, 0.0 }
 0xa6d   :  { %1237 = vadd.xlane.f32.xlu1 %v1236_v44  ;;  %1234 = vadd.xlane.f32.xlu0 %v1233_v45 }
 0xaf6   :  { %v1232_v49 = vpop.xlane.xlu0 %1231 }
 0xaf7   :  { %v1239_v50 = vmul.f32 0.03125, %v1232_v49 }
 0xaf9   :  { %v1242_v51 = vadd.f32 1e-05, %v1239_v50 }
 0xafa   :  { %v1235_v52 = vpop.xlane.xlu0 %1234  ;;  %v1238_v53 = vpop.xlane.xlu1 %1237 }
 0xafb   :  { %3612 = vrsqrt.f32 %v1242_v51  ;;  %v1240_v54 = vmul.f32 0.03125, %v1235_v52  ;;  %v1241_v55 = vmul.f32 0.03125, %v1238_v53 }
 0xafd   :  { %v1243_v56 = vadd.f32 1e-05, %v1240_v54  ;;  %v1244_v57 = vadd.f32 1e-05, %v1241_v55 }
 0xaff   :  { %3614 = vrsqrt.f32 %v1243_v56  ;;  %v2942_v56 = vld [vmem:[%s4583_s18] ss:$0 sm:$0xff] }
 0xb00   :  { %3616 = vrsqrt.f32 %v1244_v57 }
 0xb05   :  { %v3613_v58 = vpop.eup %3612 }
 0xb06   :  { %v1248_v59 = vmul.f32 %v3613_v58, %v1224_v18 }
 0xb08   :  { %v1257_v0 = vmul.f32 %v2924_v60, %v1248_v59 }
 0xb09   :  { %v3615_v61 = vpop.eup %3614 }
 0xb0a   :  { %v3617_v62 = vpop.eup %3616  ;;  %v1249_v63 = vmul.f32 %v3615_v61, %v1225_v35  ;;  %v1266_v5 = vadd.f32 %v2925_v2, %v1257_v0 }
 0xb0b   :  { %v1250_v1 = vmul.f32 %v3617_v62, %v1226_v39 }
 0xb0c   :  { %v1258_v3 = vmul.f32 %v2924_v60, %v1249_v63 }
 0xb0d   :  { %v1259_v4 = vmul.f32 %v2924_v60, %v1250_v1 }
 0xb0e   :  { %v1267_v6 = vadd.f32 %v2925_v2, %v1258_v3 }
 0xb0f   :  { %v1268_v8 = vadd.f32 %v2925_v2, %v1259_v4 }
 0xb10   :  { %v1273_v9 = vpack.c.bf16 %v1267_v6, %v1266_v5 }
 0xb11   :  { %v1274_v10 = vpack.c.bf16 %v1268_v8, %v1268_v8 }
 0xb12   :  { %3315 = vmatprep.mubr.msk.bf16.mxu0 %vm669_vm0, %v1273_v9 }
 0xb13   :  { %3316 = vmatmul.mubr.msk.bf16.vlgmr.msra.gmra.mrb[28].mxu0 %vm669_vm0, %v1274_v10 }
 0xb14   :  { %3340 = vmatpush3.bf16.msra.mxu0 %v3522_v23 }
 0xbe6   :  { %v3317_v26 = vpop.f32.mrb[28].mxu0 }
 0xbe7   :  { %v1343_v31 = vadd.f32 %v3317_v26, %v2926_v24  ;;  %v1334_v32 = vpop.f32.mrb[29].mxu0 }
 0xbe8   :  { %v1335_v13 = vadd.f32 %v2926_v24, %v1334_v32  ;;  %v3318_v22 = vpop.f32.mrb[30].mxu0 }
 0xbe9   :  { %v2933_v33 = vmul.f32 -1.702, %v1343_v31  ;;  %v1337_v34 = vpop.f32.mrb[31].mxu0 }
 0xbea   :  { %v2931_v18 = vmul.f32 -1.702, %v1335_v13  ;;  %v1338_v19 = vadd.f32 %v2926_v24, %v1337_v34  ;;  %v3523_v24 = vld [vmem:[%s4574_s9 + $0x18] sm:$0xff]  }
 0xbeb   :  { %v1358_v20 = vmul.f32 1.442695, %v2933_v33  ;;  %3341 = vmatprep.subr.bf16.mxu0 %v3523_v24 }
 0xbec   :  { %v1354_v35 = vmul.f32 1.442695, %v2931_v18  ;;  %v2932_v36 = vmul.f32 -1.702, %v1338_v19  ;;  %3342 = vmatpush3.bf16.msra.mxu0 %v3523_v24 }
 0xbed   :  { %3618 = vpow2.f32 %v1358_v20  ;;  %3347 = vmatprep.subr.bf16.mxu0 %v3698_v7 }
 0xbee   :  { %3620 = vpow2.f32 %v1354_v35  ;;  %v1356_v37 = vmul.f32 1.442695, %v2932_v36  ;;  %v2945_v35 = vld [vmem:[%s4607_s28 + $0x1] ss:$0 sm:$0xff] }
 0xbf0   :  { %3622 = vpow2.f32 %v1356_v37 }
 0xbf7   :  { %v3619_v39 = vpop.eup %3618 }
 0xbf8   :  { %v3621_v41 = vpop.eup %3620  ;;  %v1362_v42 = vadd.f32 1.0, %v3619_v39 }
 0xbf9   :  { %v1360_v43 = vadd.f32 1.0, %v3621_v41 }
 0xbfa   :  { %v3623_v44 = vpop.eup %3622  ;;  %3624 = vrcp.f32 %v1362_v42 }
 0xbfb   :  { %3626 = vrcp.f32 %v1360_v43  ;;  %v1361_v45 = vadd.f32 1.0, %v3623_v44  ;;  %v2946_v43 = vld [vmem:[%s4573_s8 + $0x1] ss:$0 sm:$0xff] }
 0xbfd   :  { %3628 = vrcp.f32 %v1361_v45 }
 0xc04   :  { %v3625_v46 = vpop.eup %3624 }
 0xc05   :  { %v3627_v48 = vpop.eup %3626  ;;  %v1371_v50 = vmul.f32 %v3625_v46, %v1343_v31 }
 0xc06   :  { %v1369_v51 = vmul.f32 %v3627_v48, %v1335_v13 }
 0xc07   :  { %v3629_v49 = vpop.eup %3628  ;;  %v1389_v54 = vpack.c.bf16 %v1371_v50, %v1371_v50 }
 0xc08   :  { %v1370_v52 = vmul.f32 %v3629_v49, %v1338_v19 }
 0xc0a   :  { %v1388_v53 = vpack.c.bf16 %v1370_v52, %v1369_v51 }
 0xc0c   :  { %3335 = vmatprep.mubr.bf16.mxu1 %v1388_v53  ;;  %v2952_v53 = vld [vmem:[%s4575_s10 + $0x1] ss:$0 sm:$0xff] }
 0xc0d   :  { %3336 = vmatmul.mubr.bf16.vlgmr.msra.gmra.mrb[28].mxu1 %v1389_v54 }
 0xc0e   :  { %3371 = vmatprep.mubr.msk.bf16.mxu1 %vm3701_vm3, %v3698_v7 }
 0xce0   :  { %v3337_v55 = vpop.f32.mrb[28].mxu1 }
 0xce1   :  { %v1472_v57 = vpop.f32.mrb[29].mxu1  ;;  %v1488_v58 = vadd.f32 %v3337_v55, %v4170_v27 }
 0xce2   :  { %v1486_v59 = vadd.f32 %v1472_v57, %v4167_v25  ;;  %v3338_v60 = vpop.f32.mrb[30].mxu1 }
 0xce3   :  { %v1475_v61 = vpop.f32.mrb[31].mxu1  ;;  %v4238_v0 = vadd.f32 %v2942_v56, %v1488_v58 }
 0xce4   :  { %v4235_v62 = vadd.f32 %v2942_v56, %v1486_v59  ;;  %v1487_v63 = vadd.f32 %v1475_v61, %v4172_v29 }
 0xce5   :  { %v1509_v25 = vsel %vm676_vm1, %v4238_v0, 0.0 }
 0xce6   :  { %v4240_v1 = vadd.f32 %v2942_v56, %v1487_v63  ;;  %v1503_v2 = vsel %vm669_vm0, %v4235_v62, 0.0 }
 0xce7   :  { %1504 = vadd.xlane.f32.xlu0 %v1503_v2 }
 0xce8   :  { %v1506_v3 = vsel %vm669_vm0, %v4240_v1, 0.0 }
 0xce9   :  { %1507 = vadd.xlane.f32.xlu1 %v1506_v3 }
 0xceb   :  { %1510 = vadd.xlane.f32.xlu0 %v1509_v25 }
 0xd74   :  { %v1505_v27 = vpop.xlane.xlu0 %1504 }
 0xd75   :  { %v1512_v4 = vmul.f32 0.03125, %v1505_v27 }
 0xd76   :  { %v1508_v5 = vpop.xlane.xlu1 %1507 }
 0xd77   :  { %v1515_v29 = vsub.f32 %v4235_v62, %v1512_v4  ;;  %v1513_v6 = vmul.f32 0.03125, %v1508_v5 }
 0xd78   :  { %v1511_v8 = vpop.xlane.xlu0 %1510 }
 0xd79   :  { %v1516_v9 = vsub.f32 %v4240_v1, %v1513_v6  ;;  %v1514_v10 = vmul.f32 0.03125, %v1511_v8  ;;  %v1518_v11 = vmul.f32 %v1515_v29, %v1515_v29 }
 0xd7b   :  { %v1517_v12 = vsub.f32 %v4238_v0, %v1514_v10  ;;  %v1521_v14 = vsel %vm669_vm0, %v1518_v11, 0.0  ;;  %v1519_v15 = vmul.f32 %v1516_v9, %v1516_v9 }
 0xd7c   :  { %1522 = vadd.xlane.f32.xlu1 %v1521_v14 }
 0xd7d   :  { %v1524_v16 = vsel %vm669_vm0, %v1519_v15, 0.0  ;;  %v1520_v17 = vmul.f32 %v1517_v12, %v1517_v12 }
 0xd7e   :  { %1525 = vadd.xlane.f32.xlu0 %v1524_v16 }
 0xd7f   :  { %v1527_v21 = vsel %vm676_vm1, %v1520_v17, 0.0 }
 0xd80   :  { %1528 = vadd.xlane.f32.xlu1 %v1527_v21 }
 0xe09   :  { %v1523_v26 = vpop.xlane.xlu1 %1522 }
 0xe0a   :  { %v1530_v31 = vmul.f32 0.03125, %v1523_v26 }
 0xe0b   :  { %v1526_v32 = vpop.xlane.xlu0 %1525 }
 0xe0c   :  { %v1533_v13 = vadd.f32 1e-05, %v1530_v31  ;;  %v1531_v22 = vmul.f32 0.03125, %v1526_v32 }
 0xe0d   :  { %v1529_v33 = vpop.xlane.xlu1 %1528 }
 0xe0e   :  { %3630 = vrsqrt.f32 %v1533_v13  ;;  %v1534_v34 = vadd.f32 1e-05, %v1531_v22  ;;  %v1532_v18 = vmul.f32 0.03125, %v1529_v33 }
 0xe10   :  { %3632 = vrsqrt.f32 %v1534_v34  ;;  %v1535_v19 = vadd.f32 1e-05, %v1532_v18 }
 0xe12   :  { %3634 = vrsqrt.f32 %v1535_v19 }
 0xe18   :  { %v3631_v20 = vpop.eup %3630 }
 0xe19   :  { %v1539_v36 = vmul.f32 %v3631_v20, %v1515_v29 }
 0xe1a   :  { %v3633_v37 = vpop.eup %3632 }
 0xe1b   :  { %v1540_v39 = vmul.f32 %v3633_v37, %v1516_v9  ;;  %v1548_v41 = vmul.f32 %v2945_v35, %v1539_v36 }
 0xe1c   :  { %v3635_v42 = vpop.eup %3634 }
 0xe1d   :  { %v1541_v44 = vmul.f32 %v3635_v42, %v1517_v12  ;;  %v1549_v45 = vmul.f32 %v2945_v35, %v1540_v39  ;;  %v1557_v46 = vadd.f32 %v2946_v43, %v1548_v41 }
 0xe1f   :  { %v1558_v48 = vadd.f32 %v2946_v43, %v1549_v45  ;;  %v1550_v49 = vmul.f32 %v2945_v35, %v1541_v44 }
 0xe21   :  { %v1565_v50 = vpack.c.bf16 %v1558_v48, %v1557_v46  ;;  %v1559_v51 = vadd.f32 %v2946_v43, %v1550_v49 }
 0xe23   :  { %3343 = vmatprep.mubr.msk.bf16.mxu0 %vm669_vm0, %v1565_v50  ;;  %v1566_v52 = vpack.c.bf16 %v1559_v51, %v1559_v51 }
 0xe25   :  { %3344 = vmatmul.mubr.msk.bf16.vlgmr.msra.gmra.mrb[32].mxu0 %vm669_vm0, %v1566_v52 }
 0xe26   :  { %3353 = vmatprep.mubr.msk.bf16.mxu0 %vm3701_vm3, %v3698_v7 }
 0xef8   :  { %v3345_v54 = vpop.f32.mrb[32].mxu0 }
 0xef9   :  { %v1636_v55 = vadd.f32 %v3345_v54, %v2952_v53  ;;  %v1627_v56 = vpop.f32.mrb[33].mxu0 }
 0xefa   :  { %v3346_v57 = vpop.f32.mrb[34].mxu0  ;;  %v1628_v60 = vadd.f32 %v2952_v53, %v1627_v56 }
 0xefb   :  { %v1630_v58 = vpop.f32.mrb[35].mxu0  ;;  %v1642_v59 = vpack.c.bf16 %v1636_v55, %v1636_v55 }
 0xefc   :  { %v1631_v61 = vadd.f32 %v2952_v53, %v1630_v58 }
 0xefd   :  { %v1646_v2 = vrot.slane %v1642_v59, 6 }
 0xefe   :  { %v1641_v63 = vpack.c.bf16 %v1631_v61, %v1628_v60 }
 0xf00   :  { %v1645_v3 = vrot.slane %v1641_v63, 6 }
 0xf02   :  { %1648 = vrot.lane.b32.xlu0 %v1645_v3, %s3699_s4  ;;  %v1647_v25 = vsel %vm876_vm2, %v1645_v3, %v1646_v2 }
 0xf03   :  { %1650 = vrot.lane.b32.xlu1 %v1647_v25, %s3699_s4 }
 0xf07   :  { %1656 = vrot.lane.b32.xlu1 %v1641_v63, %s3700_s30 }
 0xf74   :  { %v1649_v27 = vpop.permute.xlu0 %1648 }
 0xf75   :  { %v4278_v4 = vpop.permute.xlu1 %1650  ;;  %v4281_v5 = vsel %vm876_vm2, %v1642_v59, %v1649_v27 }
 0xf76   :  { %1658 = vrot.lane.b32.xlu1 %v4281_v5, %s3700_s30  ;;  %1660 = vrot.lane.b32.xlu0 %v4278_v4, %s3700_s30 }
 0xf79   :  { %v1657_v29 = vpop.permute.xlu1 %1656 }
 0xf7a   :  { %v1671_v6 = vsel %vm895_vm4, %v1657_v29, 0 }
 0xf7b   :  { %3348 = vmatpush3.bf16.xpose.msra.mxu0 %v1671_v6 }
 0xf7c   :  { %3349 = vmatprep.subr.bf16.mxu0 %v3698_v7 }
 0xfe8   :  { %v1659_v8 = vpop.permute.xlu1 %1658  ;;  %v1661_v10 = vpop.permute.xlu0 %1660 }
 0xfe9   :  { %v1674_v9 = vsel %vm895_vm4, %v1659_v8, 0  ;;  %v1677_v11 = vsel %vm895_vm4, %v1661_v10, 0 }
 0xfea   :  { %3350 = vmatpush3.bf16.xpose.msra.mxu0 %v1674_v9 }
 0xfeb   :  { %3351 = vmatprep.subr.bf16.mxu0 %v3698_v7 }
 0xff2   :  { %3352 = vmatpush3.bf16.xpose.msra.mxu0 %v1677_v11 }
 0xff9   :  { %3354 = vmatmul.mubr.msk.bf16.vlgmr.msra.gmra.mrb[36].mxu0 %vm895_vm4, %v1641_v63 }
 0xffa   :  { %3357 = vmatprep.mubr.msk.bf16.mxu0 %vm3701_vm3, %v3698_v7 }
0x1001   :  { %3358 = vmatmul.mubr.msk.bf16.gmra.mrb[40].mxu0 %vm895_vm4, %v4281_v5 }
0x1002   :  { %3361 = vmatprep.mubr.msk.bf16.mxu0 %vm3701_vm3, %v3698_v7 }
0x1009   :  { %3362 = vmatmul.mubr.msk.bf16.gmra.mrb[44].mxu0 %vm895_vm4, %v4278_v4 }
0x10cc   :  { %v1713_v12 = vpop.f32.mrb[36].mxu0 }
0x10cd   :  { %v1714_v14 = vadd.f32 %v1713_v12, %v4094_v28  ;;  %v3355_v15 = vpop.f32.mrb[37].mxu0 }
0x10ce   :  { %v1716_v16 = vpop.f32.mrb[38].mxu0 }
0x10cf   :  { %v1717_v17 = vadd.f32 %v1716_v16, %v4099_v30  ;;  %v3356_v21 = vpop.f32.mrb[39].mxu0  ;;  %v1735_v23 = vsel %vm969_vm5, %v1714_v14, -inf }
0x10d0   :  { %1736 = vmax.xlane.f32.xlu1 %v1735_v23 }
0x10d1   :  { %v1738_v24 = vsel %vm969_vm5, %v1717_v17, -inf }
0x10d2   :  { %1739 = vmax.xlane.f32.xlu0 %v1738_v24 }
0x10d4   :  { %v1721_v26 = vpop.f32.mrb[40].mxu0 }
0x10d5   :  { %v1722_v31 = vadd.f32 %v1721_v26, %v4108_v38  ;;  %v3359_v32 = vpop.f32.mrb[41].mxu0 }
0x10d6   :  { %v1724_v13 = vpop.f32.mrb[42].mxu0  ;;  %v3525_v32 = vld [vmem:[%s4576_s11 + $0x18] sm:$0xff]  }
0x10d7   :  { %v1725_v22 = vadd.f32 %v1724_v13, %v4113_v40  ;;  %v3360_v33 = vpop.f32.mrb[43].mxu0  ;;  %v1741_v28 = vsel %vm969_vm5, %v1722_v31, -inf }
0x10d8   :  { %1742 = vmax.xlane.f32.xlu0 %v1741_v28 }
0x10d9   :  { %v1744_v30 = vsel %vm969_vm5, %v1725_v22, -inf }
0x10dc   :  { %1745 = vmax.xlane.f32.xlu0 %v1744_v30  ;;  %v1729_v34 = vpop.f32.mrb[44].mxu0 }
0x10dd   :  { %v1730_v18 = vadd.f32 %v1729_v34, %v4121_v47  ;;  %v3363_v19 = vpop.f32.mrb[45].mxu0 }
0x10de   :  { %v1732_v20 = vpop.f32.mrb[46].mxu0 }
0x10df   :  { %v3364_v35 = vpop.f32.mrb[47].mxu0  ;;  %v1747_v36 = vsel %vm969_vm5, %v1730_v18, -inf }
0x10e0   :  { %1748 = vmax.xlane.f32.xlu1 %v1747_v36 }
0x10f1   :  { %1793 = vrot.lane.b32.xlu1 %v1641_v63, %s3702_s0 }
0x115d   :  { %v1737_v38 = vpop.xlane.xlu1 %1736 }
0x115e   :  { %v1750_v40 = vsub.f32 %v1714_v14, %v1737_v38 }
0x115f   :  { %v1740_v37 = vpop.xlane.xlu0 %1739 }
0x1160   :  { %v1755_v39 = vmul.f32 1.442695, %v1750_v40  ;;  %v1751_v41 = vsub.f32 %v1717_v17, %v1740_v37 }
0x1162   :  { %3636 = vpow2.f32 %v1755_v39  ;;  %v1757_v42 = vmul.f32 1.442695, %v1751_v41 }
0x1164   :  { %3638 = vpow2.f32 %v1757_v42 }
0x1165   :  { %v1743_v43 = vpop.xlane.xlu0 %1742 }
0x1166   :  { %v1752_v44 = vsub.f32 %v1722_v31, %v1743_v43  ;;  %v3524_v31 = vld [vmem:[%s4576_s11 + $0x10] sm:$0xff]  }
0x1167   :  { %3383 = vmatprep.subr.bf16.mxu0 %v3524_v31 }
0x1168   :  { %v1759_v45 = vmul.f32 1.442695, %v1752_v44  ;;  %3384 = vmatpush3.bf16.msra.mxu0 %v3524_v31 }
0x1169   :  { %v1746_v47 = vpop.xlane.xlu0 %1745  ;;  %3385 = vmatprep.subr.bf16.mxu0 %v3525_v32 }
0x116a   :  { %3640 = vpow2.f32 %v1759_v45  ;;  %v1753_v46 = vsub.f32 %v1725_v22, %v1746_v47 }
0x116c   :  { %v3637_v48 = vpop.eup %3636  ;;  %v1761_v49 = vmul.f32 1.442695, %v1753_v46  ;;  %3386 = vmatpush3.bf16.msra.mxu0 %v3525_v32 }
0x116d   :  { %v1749_v50 = vpop.xlane.xlu1 %1748  ;;  %v1765_v51 = vsel %vm969_vm5, %v3637_v48, 0.0 }
0x116e   :  { %v3639_v52 = vpop.eup %3638  ;;  %3642 = vpow2.f32 %v1761_v49  ;;  %v1754_v53 = vsub.f32 %v1730_v18, %v1749_v50  ;;  %1766 = vadd.xlane.f32.xlu0 %v1765_v51 }
0x116f   :  { %v1768_v54 = vsel %vm969_vm5, %v3639_v52, 0.0 }
0x1170   :  { %v1763_v55 = vmul.f32 1.442695, %v1754_v53  ;;  %1769 = vadd.xlane.f32.xlu1 %v1768_v54  ;;  %v2972_v54 = vld [vmem:[%s4577_s12 + $0x1] ss:$0 sm:$0xff] }
0x1171   :  { %v1794_v56 = vpop.permute.xlu1 %1793 }
0x1172   :  { %3644 = vpow2.f32 %v1763_v55  ;;  %3366 = vmatpush3.bf16.msra.mxu1 %v1794_v56 }
0x1173   :  { %3367 = vmatprep.subr.bf16.mxu1 %v3698_v7 }
0x1174   :  { %v3641_v57 = vpop.eup %3640 }
0x1175   :  { %v1771_v58 = vsel %vm969_vm5, %v3641_v57, 0.0 }
0x1176   :  { %1772 = vadd.xlane.f32.xlu0 %v1771_v58 }
0x1178   :  { %v3643_v59 = vpop.eup %3642 }
0x1179   :  { %v1774_v60 = vsel %vm969_vm5, %v3643_v59, 0.0 }
0x117a   :  { %1775 = vadd.xlane.f32.xlu1 %v1774_v60 }
0x117c   :  { %v3645_v61 = vpop.eup %3644 }
0x117d   :  { %v1777_v63 = vsel %vm969_vm5, %v3645_v61, 0.0 }
0x117e   :  { %1778 = vadd.xlane.f32.xlu0 %v1777_v63 }
0x118b   :  { %1797 = vrot.lane.b32.xlu1 %v4278_v4, %s3702_s0 }
0x1194   :  { %1795 = vrot.lane.b32.xlu0 %v4281_v5, %s3702_s0 }
0x11fb   :  { %v1767_v3 = vpop.xlane.xlu0 %1766 }
0x11fd   :  { %v1770_v2 = vpop.xlane.xlu1 %1769 }
0x11fe   :  { %3646 = vrcp.f32 %v1770_v2 }
0x11ff   :  { %3648 = vrcp.f32 %v1767_v3 }
0x1203   :  { %v1773_v25 = vpop.xlane.xlu0 %1772 }
0x1207   :  { %v1776_v27 = vpop.xlane.xlu1 %1775 }
0x1208   :  { %3650 = vrcp.f32 %v1776_v27  ;;  %v3647_v6 = vpop.eup %3646 }
0x1209   :  { %3652 = vrcp.f32 %v1773_v25  ;;  %v3649_v9 = vpop.eup %3648  ;;  %v1786_v11 = vmul.f32 %v3647_v6, %v3639_v52 }
0x120a   :  { %v1785_v4 = vmul.f32 %v3649_v9, %v3637_v48 }
0x120b   :  { %v1779_v29 = vpop.xlane.xlu0 %1778  ;;  %v1798_v10 = vpop.permute.xlu1 %1797 }
0x120c   :  { %v1811_v5 = vsel %vm1045_vm6, %v1798_v10, 0  ;;  %3654 = vrcp.f32 %v1779_v29  ;;  %v1790_v12 = vpack.c.bf16 %v1786_v11, %v1785_v4 }
0x120f   :  { %v1796_v8 = vpop.permute.xlu0 %1795 }
0x1210   :  { %3368 = vmatpush3.bf16.msra.mxu1 %v1796_v8 }
0x1211   :  { %3369 = vmatprep.subr.bf16.mxu1 %v3698_v7 }
0x1212   :  { %v3651_v14 = vpop.eup %3650 }
0x1213   :  { %v3653_v15 = vpop.eup %3652  ;;  %v1788_v16 = vmul.f32 %v3651_v14, %v3643_v59 }
0x1214   :  { %3370 = vmatpush3.bf16.msra.mxu1 %v1811_v5  ;;  %v1787_v17 = vmul.f32 %v3653_v15, %v3641_v57 }
0x1216   :  { %v1791_v21 = vpack.c.bf16 %v1788_v16, %v1787_v17  ;;  %v3655_v23 = vpop.eup %3654  ;;  %v3526_v17 = vld [vmem:[%s4580_s15 + $0x10] sm:$0xff]  }
0x1217   :  { %3372 = vmatmul.mubr.msk.bf16.vlgmr.msra.gmra.mrb[32].mxu1 %vm969_vm5, %v1790_v12  ;;  %v1789_v24 = vmul.f32 %v3655_v23, %v3645_v61  ;;  %3391 = vmatprep.subr.bf16.mxu1 %v3526_v17 }
0x1218   :  { %3375 = vmatprep.mubr.msk.bf16.mxu1 %vm3701_vm3, %v3698_v7  ;;  %3392 = vmatpush3.bf16.msra.mxu1 %v3526_v17 }
0x1219   :  { %v1792_v26 = vpack.c.bf16 %v1789_v24, %v1789_v24 }
0x121f   :  { %3376 = vmatmul.mubr.msk.bf16.gmra.mrb[36].mxu1 %vm969_vm5, %v1791_v21  ;;  %v3527_v21 = vld [vmem:[%s4580_s15 + $0x18] sm:$0xff]  }
0x1220   :  { %3379 = vmatprep.mubr.msk.bf16.mxu1 %vm3701_vm3, %v3698_v7  ;;  %3393 = vmatprep.subr.bf16.mxu1 %v3527_v21 }
0x1221   :  { %3394 = vmatpush3.bf16.msra.mxu1 %v3527_v21 }
0x1222   :  { %3419 = vmatprep.subr.bf16.mxu1 %v3698_v7 }
0x1227   :  { %3380 = vmatmul.mubr.msk.bf16.gmra.mrb[40].mxu1 %vm969_vm5, %v1792_v26 }
0x12ea   :  { %v1847_v13 = vpop.f32.mrb[32].mxu1 }
0x12eb   :  { %v3373_v22 = vpop.f32.mrb[33].mxu1 }
0x12ec   :  { %v1850_v33 = vpop.f32.mrb[34].mxu1 }
0x12ed   :  { %v3374_v28 = vpop.f32.mrb[35].mxu1 }
0x12f2   :  { %v1855_v30 = vpop.f32.mrb[36].mxu1 }
0x12f3   :  { %v3377_v34 = vpop.f32.mrb[37].mxu1  ;;  %v1872_v19 = vrot.slane %v1855_v30, 4 }
0x12f4   :  { %v1858_v18 = vpop.f32.mrb[38].mxu1 }
0x12f5   :  { %v1873_v20 = vrot.slane %v1858_v18, 4  ;;  %v3378_v35 = vpop.f32.mrb[39].mxu1  ;;  %v2975_v18 = vld [vmem:[%s4578_s13 + $0x1] ss:$0 sm:$0xff]  ;;  %s2836_s13 = sshll.u32 %s3705_s7, 4  ;;  %s2837_s13 = int_to_ptr.vmem [resolvable:$true] %s2836_s13 }
0x12f6   :  { %s3674_s27 = scalar_lea.vmem %s2837_s13, 32  ;;  %p3679_p1 = scmp.lt.s32.totalorder %s2837_s13, %s2837_s13 }
0x12f7   :  { %v1874_v36 = vsel %vm1045_vm6, %v1872_v19, %v1873_v20  ;;  %p3675_p0 = scmp.ne.s32.totalorder %s2837_s13, %s3674_s27  ;;  %p3680_p2 = scmp.lt.s32.totalorder %s3674_s27, %s3674_s27 }
0x12f9   :  { %p3681_p3 = por %p3680_p2, %p3679_p1 }
0x12fa   :  { %v1863_v38 = vpop.f32.mrb[40].mxu1 }
0x12fb   :  { %v1875_v40 = vrot.slane %v1863_v38, 4  ;;  %v3381_v37 = vpop.f32.mrb[41].mxu1  ;;  %p3682_p4 = pnand %p3681_p3, %p3675_p0 }
0x12fc   :  { %v1866_v39 = vpop.f32.mrb[42].mxu1 }
0x12fd   :  { %v3382_v41 = vpop.f32.mrb[43].mxu1  ;;  %v1876_v42 = vsel %vm1045_vm6, %v1873_v20, %v1875_v40 }
0x12fe   :  { %v3440_v43 = vpack.i.bf16 %v1876_v42, %v1874_v36 }
0x1300   :  { %3441 = vrot.lane.b32.xlu1 %v3440_v43, %s3703_s2 }
0x1304   :  { %1881 = vrot.lane.b32.xlu1 %v1875_v40, %s3703_s2  ;;  %v2976_v40 = vld [vmem:[%s4579_s14 + $0x1] ss:$0 sm:$0xff] }
0x1372   :  { %v3442_v44 = vpop.permute.xlu1 %3441 }
0x1373   :  { %v3444_v45 = vunpack.i.h.bf16 %v3442_v44  ;;  %v3443_v47 = vunpack.i.l.bf16 %v3442_v44 }
0x1375   :  { %v1887_v46 = vsel %vm895_vm4, %v1850_v33, %v3444_v45  ;;  %v1886_v48 = vsel %vm895_vm4, %v1847_v13, %v3443_v47  ;;  %v3528_v47 = vld [vmem:[%s4582_s17 + $0x40] sm:$0xff]  }
0x1376   :  { %v1894_v49 = vpack.c.bf16 %v1887_v46, %v1886_v48  ;;  %v1882_v50 = vpop.permute.xlu1 %1881  ;;  %3399 = vmatprep.subr.bf16.mxu0 %v3528_v47  ;;  %v3529_v46 = vld [vmem:[%s4582_s17 + $0x48] sm:$0xff]   ;;  %v3530_v48 = vld [vmem:[%s4582_s17 + $0x50] sm:$0xff]  }
0x1377   :  { %v1888_v51 = vsel %vm895_vm4, %v1855_v30, %v1882_v50  ;;  %v3532_v50 = vld [vmem:[%s4582_s17 + $0x60] sm:$0xff]  }
0x1378   :  { %v1895_v52 = vpack.c.bf16 %v1888_v51, %v1888_v51  ;;  %3387 = vmatprep.mubr.msk.bf16.mxu0 %vm669_vm0, %v1894_v49  ;;  %v3531_v49 = vld [vmem:[%s4582_s17 + $0x58] sm:$0xff]   ;;  %v3533_v51 = vld [vmem:[%s4582_s17 + $0x68] sm:$0xff]  }
0x137a   :  { %3388 = vmatmul.mubr.msk.bf16.vlgmr.msra.gmra.mrb[48].mxu0 %vm669_vm0, %v1895_v52  ;;  %v3534_v52 = vld [vmem:[%s4582_s17 + $0x70] sm:$0xff]  }
0x137b   :  { %3400 = vmatpush3.bf16.msra.mxu0 %v3528_v47  ;;  %v3567_v47 = vld [vmem:[%s4586_s21 + $0x98] sm:$0xff]  }
0x137c   :  { %3401 = vmatprep.subr.bf16.mxu0 %v3529_v46 }
0x137f   :  { %3402 = vmatpush3.bf16.msra.mxu0 %v3529_v46 }
0x1380   :  { %3403 = vmatprep.subr.bf16.mxu0 %v3530_v48 }
0x1383   :  { %3404 = vmatpush3.bf16.msra.mxu0 %v3530_v48  ;;  %v3542_v48 = vld [vmem:[%s4584_s19 + $0x8] ss:$16 sps:$4 sm:$0xff]  }
0x1384   :  { %3405 = vmatprep.subr.bf16.mxu0 %v3531_v49 }
0x1387   :  { %3406 = vmatpush3.bf16.msra.mxu0 %v3531_v49 }
0x1388   :  { %3407 = vmatprep.subr.bf16.mxu0 %v3532_v50 }
0x138b   :  { %3408 = vmatpush3.bf16.msra.mxu0 %v3532_v50 }
0x138c   :  { %3409 = vmatprep.subr.bf16.mxu0 %v3533_v51 }
0x138f   :  { %3410 = vmatpush3.bf16.msra.mxu0 %v3533_v51  ;;  %v3547_v51 = vld [vmem:[%s4584_s19 + $0x2c] ss:$16 sps:$4 sm:$0xff]  }
0x1390   :  { %3411 = vmatprep.subr.bf16.mxu0 %v3534_v52 }
0x1393   :  { %3412 = vmatpush3.bf16.msra.mxu0 %v3534_v52 }
0x144d   :  { %v3389_v53 = vpop.f32.mrb[48].mxu0 }
0x144e   :  { %v1948_v55 = vpop.f32.mrb[49].mxu0  ;;  %v1964_v56 = vadd.f32 %v3389_v53, %v4238_v0  ;;  %v3535_v53 = vld [vmem:[%s4582_s17 + $0x78] sm:$0xff]  }
0x144f   :  { %v1962_v57 = vadd.f32 %v1948_v55, %v4235_v62  ;;  %v3390_v58 = vpop.f32.mrb[50].mxu0  ;;  %3413 = vmatprep.subr.bf16.mxu0 %v3535_v53 }
0x1450   :  { %v1951_v59 = vpop.f32.mrb[51].mxu0  ;;  %v4354_v63 = vadd.f32 %v2972_v54, %v1964_v56  ;;  %3414 = vmatpush3.bf16.msra.mxu0 %v3535_v53 }
0x1451   :  { %v4351_v60 = vadd.f32 %v2972_v54, %v1962_v57  ;;  %v1963_v61 = vadd.f32 %v1951_v59, %v4240_v1 }
0x1452   :  { %v1986_v62 = vsel %vm676_vm1, %v4354_v63, 0.0 }
0x1453   :  { %v4356_v2 = vadd.f32 %v2972_v54, %v1963_v61  ;;  %v1980_v3 = vsel %vm669_vm0, %v4351_v60, 0.0  ;;  %v2982_v54 = vld [vmem:[%s4581_s16 + $0x1] ss:$0 sm:$0xff] }
0x1454   :  { %1981 = vadd.xlane.f32.xlu0 %v1980_v3 }
0x1455   :  { %v1983_v25 = vsel %vm669_vm0, %v4356_v2, 0.0 }
0x1456   :  { %1984 = vadd.xlane.f32.xlu1 %v1983_v25 }
0x1458   :  { %1987 = vadd.xlane.f32.xlu0 %v1986_v62 }
0x14e1   :  { %v1982_v0 = vpop.xlane.xlu0 %1981 }
0x14e2   :  { %v1989_v27 = vmul.f32 0.03125, %v1982_v0 }
0x14e3   :  { %v1985_v29 = vpop.xlane.xlu1 %1984 }
0x14e4   :  { %v1992_v1 = vsub.f32 %v4351_v60, %v1989_v27  ;;  %v1990_v6 = vmul.f32 0.03125, %v1985_v29 }
0x14e5   :  { %v1988_v8 = vpop.xlane.xlu0 %1987 }
0x14e6   :  { %v1993_v9 = vsub.f32 %v4356_v2, %v1990_v6  ;;  %v1991_v10 = vmul.f32 0.03125, %v1988_v8  ;;  %v1995_v11 = vmul.f32 %v1992_v1, %v1992_v1 }
0x14e8   :  { %v1994_v4 = vsub.f32 %v4354_v63, %v1991_v10  ;;  %v1998_v5 = vsel %vm669_vm0, %v1995_v11, 0.0  ;;  %v1996_v12 = vmul.f32 %v1993_v9, %v1993_v9 }
0x14e9   :  { %1999 = vadd.xlane.f32.xlu0 %v1998_v5 }
0x14ea   :  { %v1997_v14 = vmul.f32 %v1994_v4, %v1994_v4  ;;  %v2001_v16 = vsel %vm669_vm0, %v1996_v12, 0.0 }
0x14ec   :  { %v2004_v15 = vsel %vm676_vm1, %v1997_v14, 0.0 }
0x14ed   :  { %2005 = vadd.xlane.f32.xlu1 %v2004_v15  ;;  %2002 = vadd.xlane.f32.xlu0 %v2001_v16 }
0x1576   :  { %v2000_v23 = vpop.xlane.xlu0 %1999 }
0x1577   :  { %v2007_v24 = vmul.f32 0.03125, %v2000_v23 }
0x1579   :  { %v2010_v26 = vadd.f32 1e-05, %v2007_v24 }
0x157a   :  { %v2003_v31 = vpop.xlane.xlu0 %2002  ;;  %v2006_v32 = vpop.xlane.xlu1 %2005 }
0x157b   :  { %3656 = vrsqrt.f32 %v2010_v26  ;;  %v2008_v13 = vmul.f32 0.03125, %v2003_v31  ;;  %v2009_v22 = vmul.f32 0.03125, %v2006_v32  ;;  %v3015_v32 = vld [vmem:[%s4583_s18 + $0x1] ss:$0 sm:$0xff] }
0x157d   :  { %v2011_v33 = vadd.f32 1e-05, %v2008_v13  ;;  %v2012_v28 = vadd.f32 1e-05, %v2009_v22 }
0x157f   :  { %3658 = vrsqrt.f32 %v2011_v33 }
0x1580   :  { %3660 = vrsqrt.f32 %v2012_v28 }
0x1585   :  { %v3657_v30 = vpop.eup %3656 }
0x1586   :  { %v2016_v34 = vmul.f32 %v3657_v30, %v1992_v1 }
0x1588   :  { %v2025_v36 = vmul.f32 %v2975_v18, %v2016_v34 }
0x1589   :  { %v3659_v19 = vpop.eup %3658 }
0x158a   :  { %v3661_v20 = vpop.eup %3660  ;;  %v2017_v35 = vmul.f32 %v3659_v19, %v1993_v9  ;;  %v2034_v41 = vadd.f32 %v2976_v40, %v2025_v36  ;;  %v3539_v36 = vld [vmem:[%s4584_s19 + $0x20] ss:$16 sps:$4 sm:$0xff]  }
0x158b   :  { %v2018_v38 = vmul.f32 %v3661_v20, %v1994_v4 }
0x158c   :  { %v2026_v37 = vmul.f32 %v2975_v18, %v2017_v35 }
0x158d   :  { %v2027_v39 = vmul.f32 %v2975_v18, %v2018_v38  ;;  %v3544_v38 = vld [vmem:[%s4584_s19 + $0xc] ss:$16 sps:$4 sm:$0xff]  }
0x158e   :  { %v2035_v42 = vadd.f32 %v2976_v40, %v2026_v37  ;;  %v3553_v37 = vld [vmem:[%s4586_s21 + $0xc0] sm:$0xff]  }
0x158f   :  { %v2036_v43 = vadd.f32 %v2976_v40, %v2027_v39  ;;  %v3704_v40 = vmov 0   ;;  %3237 = vmatprep.subr.bf16.mxu0 %v3553_v37  ;;  %v3555_v39 = vld [vmem:[%s4586_s21 + $0x80] sm:$0xff]  }
0x1590   :  { %v2042_v44 = vpack.c.bf16 %v2035_v42, %v2034_v41  ;;  %v3557_v41 = vld [vmem:[%s4586_s21 + $0xc8] sm:$0xff]  }
0x1591   :  { %v2043_v45 = vpack.c.bf16 %v2036_v43, %v2036_v43  ;;  %v3559_v42 = vld [vmem:[%s4586_s21 + $0x88] sm:$0xff]   ;;  %v3561_v43 = vld [vmem:[%s4586_s21 + $0xd0] sm:$0xff]  }
0x1592   :  { %3395 = vmatprep.mubr.msk.bf16.mxu1 %vm669_vm0, %v2042_v44  ;;  %v3563_v44 = vld [vmem:[%s4586_s21 + $0x90] sm:$0xff]  }
0x1593   :  { %3396 = vmatmul.mubr.msk.bf16.vlgmr.msra.gmra.mrb[44].mxu1 %vm669_vm0, %v2043_v45  ;;  %v3565_v45 = vld [vmem:[%s4586_s21 + $0xd8] sm:$0xff]  }
0x1594   :  { %3423 = vmatprep.mubr.msk.bf16.mxu1 %vm3701_vm3, %v3698_v7 }
0x1666   :  { %v3397_v55 = vpop.f32.mrb[44].mxu1 }
0x1667   :  { %v2113_v56 = vadd.f32 %v3397_v55, %v2982_v54  ;;  %v2104_v57 = vpop.f32.mrb[45].mxu1  ;;  %v3548_v55 = vld [vmem:[%s4586_s21 + $0x40] sm:$0xff]  }
0x1668   :  { %v2105_v58 = vadd.f32 %v2982_v54, %v2104_v57  ;;  %v3398_v59 = vpop.f32.mrb[46].mxu1  ;;  %v3550_v57 = vld [vmem:[%s4586_s21 + $0x48] sm:$0xff]  }
0x1669   :  { %v2989_v61 = vmul.f32 -1.702, %v2113_v56  ;;  %v2107_v3 = vpop.f32.mrb[47].mxu1  ;;  %v3552_v59 = vld [vmem:[%s4586_s21 + $0x50] sm:$0xff]  }
0x166a   :  { %v2987_v25 = vmul.f32 -1.702, %v2105_v58  ;;  %v2108_v62 = vadd.f32 %v2982_v54, %v2107_v3  ;;  %v3545_v54 = vld [vmem:[%s4584_s19 + $0x28] ss:$16 sps:$4 sm:$0xff]  }
0x166b   :  { %v2128_v0 = vmul.f32 1.442695, %v2989_v61  ;;  %v3554_v61 = vld [vmem:[%s4586_s21 + $0x10] sm:$0xff]   ;;  %v3556_v3 = vld [vmem:[%s4586_s21 + $0x58] sm:$0xff]  }
0x166c   :  { %v2124_v27 = vmul.f32 1.442695, %v2987_v25  ;;  %v2988_v29 = vmul.f32 -1.702, %v2108_v62  ;;  %v3558_v25 = vld [vmem:[%s4586_s21 + $0x18] sm:$0xff]  }
0x166d   :  { %3662 = vpow2.f32 %v2128_v0  ;;  %v3562_v0 = vld [vmem:[%s4586_s21 + $0x20] sm:$0xff]  }
0x166e   :  { %3664 = vpow2.f32 %v2124_v27  ;;  %v2126_v1 = vmul.f32 1.442695, %v2988_v29  ;;  %v3564_v27 = vld [vmem:[%s4586_s21 + $0x68] sm:$0xff]  }
0x166f   :  { %v3566_v29 = vld [vmem:[%s4586_s21 + $0x28] sm:$0xff]  }
0x1670   :  { %3666 = vpow2.f32 %v2126_v1  ;;  %v3568_v1 = vld [vmem:[%s4586_s21 + $0x70] sm:$0xff]  }
0x1677   :  { %v3663_v6 = vpop.eup %3662 }
0x1678   :  { %v3665_v8 = vpop.eup %3664  ;;  %v2132_v9 = vadd.f32 1.0, %v3663_v6  ;;  %v3569_v6 = vld [vmem:[%s4586_s21 + $0xe0] sm:$0xff]  }
0x1679   :  { %v2130_v10 = vadd.f32 1.0, %v3665_v8  ;;  %v3570_v8 = vld [vmem:[%s4586_s21 + $0x30] sm:$0xff]  }
0x167a   :  { %v3667_v11 = vpop.eup %3666  ;;  %3668 = vrcp.f32 %v2132_v9  ;;  %v3571_v9 = vld [vmem:[%s4586_s21 + $0xa0] sm:$0xff]  }
0x167b   :  { %3670 = vrcp.f32 %v2130_v10  ;;  %v2131_v4 = vadd.f32 1.0, %v3667_v11  ;;  %v3572_v10 = vld [vmem:[%s4586_s21 + $0x78] sm:$0xff]   ;;  %v3573_v11 = vld [vmem:[%s4586_s21 + $0xe8] sm:$0xff]  }
0x167d   :  { %3672 = vrcp.f32 %v2131_v4  ;;  %v3574_v4 = vld [vmem:[%s4586_s21 + $0x38] sm:$0xff]  }
0x1684   :  { %v3669_v5 = vpop.eup %3668 }
0x1685   :  { %v3671_v12 = vpop.eup %3670  ;;  %v2141_v15 = vmul.f32 %v3669_v5, %v2113_v56  ;;  %v3549_v56 = vld [vmem:[%s4586_s21] sm:$0xff]   ;;  %v3575_v5 = vld [vmem:[%s4586_s21 + $0xa8] sm:$0xff]  }
0x1686   :  { %v2139_v16 = vmul.f32 %v3671_v12, %v2105_v58  ;;  %v3551_v58 = vld [vmem:[%s4586_s21 + $0x8] sm:$0xff]   ;;  %v3576_v12 = vld [vmem:[%s4586_s21 + $0xf0] sm:$0xff]  }
0x1687   :  { %v3673_v14 = vpop.eup %3672  ;;  %v2160_v23 = vpack.c.bf16 %v2141_v15, %v2141_v15  ;;  %v3578_v15 = vld [vmem:[%s4586_s21 + $0xf8] sm:$0xff]  }
0x1688   :  { %v2140_v17 = vmul.f32 %v3673_v14, %v2108_v62  ;;  %v3560_v62 = vld [vmem:[%s4586_s21 + $0x60] sm:$0xff]   ;;  %v3577_v14 = vld [vmem:[%s4586_s21 + $0xb0] sm:$0xff]  }
0x168a   :  { %v2159_v21 = vpack.c.bf16 %v2140_v17, %v2139_v16  ;;  %v3579_v16 = vld [vmem:[%s4586_s21 + $0xb8] sm:$0xff]   ;;  %v2332_v17 = vlaneseq }
0x168c   :  { %3415 = vmatprep.mubr.bf16.mxu0 %v2159_v21  ;;  %v2333_v21 = vshrl.u32 %v2332_v17, 7 }
0x168d   :  { %3416 = vmatmul.mubr.bf16.vlgmr.msra.gmra.mrb[52].mxu0 %v2160_v23 }
0x168e   :  { %3238 = vmatpush3.bf16.msra.mxu0 %v3555_v39  ;;  %v2334_v23 = vsub.s32 0, %v2333_v21 }
0x168f   :  { %3239 = vmatprep.subr.bf16.mxu0 %v3557_v41 }
0x1692   :  { %3240 = vmatpush3.bf16.msra.mxu0 %v3559_v42 }
0x1693   :  { %3241 = vmatprep.subr.bf16.mxu0 %v3561_v43 }
0x1696   :  { %3242 = vmatpush3.bf16.msra.mxu0 %v3563_v44 }
0x1697   :  { %3243 = vmatprep.subr.bf16.mxu0 %v3565_v45 }
0x169a   :  { %3244 = vmatpush3.bf16.msra.mxu0 %v3567_v47 }
0x169b   :  { %3245 = vmatprep.subr.bf16.mxu0 %v3569_v6 }
0x169e   :  { %3246 = vmatpush3.bf16.msra.mxu0 %v3571_v9 }
0x169f   :  { %3247 = vmatprep.subr.bf16.mxu0 %v3573_v11 }
0x16a2   :  { %3248 = vmatpush3.bf16.msra.mxu0 %v3575_v5 }
0x16a3   :  { %3249 = vmatprep.subr.bf16.mxu0 %v3576_v12 }
0x16a6   :  { %3250 = vmatpush3.bf16.msra.mxu0 %v3577_v14 }
0x16a7   :  { %3251 = vmatprep.subr.bf16.mxu0 %v3578_v15 }
0x16aa   :  { %3252 = vmatpush3.bf16.msra.mxu0 %v3579_v16 }
0x1760   :  { %v3417_v24 = vpop.f32.mrb[52].mxu0 }
0x1761   :  { %v2259_v26 = vadd.f32 %v3417_v24, %v4354_v63  ;;  %v2243_v31 = vpop.f32.mrb[53].mxu0  ;;  %v3538_v63 = vld [vmem:[%s4584_s19 + $0x4] ss:$16 sps:$4 sm:$0xff]   ;;  %v2330_v24 = vld [vmem:[%s4585_s20] sm:$0xf] }
0x1762   :  { %v2257_v13 = vadd.f32 %v2243_v31, %v4351_v60  ;;  %v3418_v22 = vpop.f32.mrb[54].mxu0  ;;  %v2271_v60 = vld [vmem:[%s4609_s6] sm:$0x1]  ;;  %v2335_v31 = vrot.slane %v2330_v24, %v2334_v23 }
0x1763   :  { %v2246_v33 = vpop.f32.mrb[55].mxu0  ;;  %v2270_v30 = vadd.f32 %v3015_v32, %v2259_v26  ;;  %v2338_v26 = vsub.s32 1, %v2333_v21 }
0x1764   :  { %v2258_v28 = vadd.f32 %v2246_v33, %v4356_v2  ;;  %v2268_v34 = vadd.f32 %v3015_v32, %v2257_v13  ;;  %v3536_v2 = vld [vmem:[%s4584_s19] ss:$16 sps:$4 sm:$0xff]  }
0x1765   :  { %v2273_v20 = vpack.c.bf16 %v2270_v30, %v2270_v30 }
0x1766   :  { %v2269_v18 = vadd.f32 %v3015_v32, %v2258_v28  ;;  %v2339_v32 = vrot.slane %v2330_v24, %v2338_v26  ;;  %v2342_v28 = vsub.s32 2, %v2333_v21 }
0x1767   :  { %v2279_v35 = vsel %vm876_vm2, %v2273_v20, 0 }
0x1768   :  { %v2272_v19 = vpack.c.bf16 %v2269_v18, %v2268_v34  ;;  %v2346_v18 = vsub.s32 3, %v2333_v21 }
0x176a   :  { %3420 = vmatpush3.bf16.msra.mxu1 %v2272_v19 }
0x176b   :  { %3421 = vmatprep.subr.bf16.mxu1 %v3698_v7  ;;  %v3541_v7 = vld [vmem:[%s4584_s19 + $0x24] ss:$16 sps:$4 sm:$0xff]  }
0x176e   :  { %3422 = vmatpush3.bf16.msra.mxu1 %v2279_v35  ;;  %v2343_v35 = vrot.slane %v2330_v24, %v2342_v28 }
0x176f   :  { %2395 = vmatprep.subr.bf16.mxu1 %v3538_v63 }
0x1771   :  { %3424 = vmatmul.mubr.msk.bf16.vlgmr.msra.gmra.mrb[48].mxu1 %vm2274_vm7, %v2271_v60 }
0x1772   :  { %2396 = vmatpush1.bf16.msra.mxu1 %v3536_v2  ;;  %2427 = vmatprep.mubr.bf16.mxu1 %v3704_v40  ;;  %v2347_v2 = vrot.slane %v2330_v24, %v2346_v18 }
0x1773   :  { %2397 = vmatprep.subr.bf16.mxu1 %v3541_v7 }
0x1776   :  { %2398 = vmatpush1.bf16.msra.mxu1 %v3539_v36 }
0x1777   :  { %2436 = vmatprep.subr.bf16.mxu1 %v3544_v38 }
0x1844   :  { %v2315_v46 = vpop.f32.mrb[48].mxu1 }
0x1845   :  { %v2329_v49 = vpack.c.bf16 %v2315_v46, %v2315_v46  ;;  %v3425_v50 = vpop.f32.mrb[49].mxu1 }
0x1846   :  { %v2318_v52 = vpop.f32.mrb[50].mxu1 }
0x1847   :  { %v3426_v53 = vpop.f32.mrb[51].mxu1  ;;  %3025 = vmatmul.mubr.msk.bf16.vlgmr.msra.gmra.mrb[52].mxu1 %vm669_vm0, %v2329_v49 }
0x1848   :  { %2437 = vmatpush1.bf16.msra.mxu1 %v3542_v48  ;;  %2468 = vmatprep.mubr.bf16.mxu1 %v3704_v40 }
0x1849   :  { %2438 = vmatprep.subr.bf16.mxu1 %v3547_v51  ;;  %v3027_v51 = vld [vmem:[%s4587_s22] ss:$0 sm:$0xff] }
0x184c   :  { %2439 = vmatpush1.bf16.msra.mxu1 %v3545_v54 }
0x184d   :  { %3215 = vmatprep.subr.bf16.mxu1 %v3548_v55 }
0x184f   :  { %3026 = vmatmul.mubr.msk.bf16.vlgmr.msra.gmra.mrb[56].mxu1 %vm669_vm0, %v2329_v49 }
0x1850   :  { %3216 = vmatpush3.bf16.msra.mxu1 %v3549_v56 }
0x1851   :  { %3217 = vmatprep.subr.bf16.mxu1 %v3550_v57 }
0x1854   :  { %3218 = vmatpush3.bf16.msra.mxu1 %v3551_v58 }
0x1855   :  { %3219 = vmatprep.subr.bf16.mxu1 %v3552_v59 }
0x1858   :  { %3220 = vmatpush3.bf16.msra.mxu1 %v3554_v61 }
0x1859   :  { %3221 = vmatprep.subr.bf16.mxu1 %v3556_v3 }
0x185c   :  { %3222 = vmatpush3.bf16.msra.mxu1 %v3558_v25 }
0x185d   :  { %3223 = vmatprep.subr.bf16.mxu1 %v3560_v62 }
0x1860   :  { %3224 = vmatpush3.bf16.msra.mxu1 %v3562_v0 }
0x1861   :  { %3225 = vmatprep.subr.bf16.mxu1 %v3564_v27 }
0x1864   :  { %3226 = vmatpush3.bf16.msra.mxu1 %v3566_v29 }
0x1865   :  { %3227 = vmatprep.subr.bf16.mxu1 %v3568_v1 }
0x1868   :  { %3228 = vmatpush3.bf16.msra.mxu1 %v3570_v8 }
0x1869   :  { %3229 = vmatprep.subr.bf16.mxu1 %v3572_v10 }
0x186c   :  { %3230 = vmatpush3.bf16.msra.mxu1 %v3574_v4 }
0x191a   :  { %v2429_v13 = vpop.f32.mrb[52].mxu1 }
0x191b   :  { %v2430_v22 = vadd.f32 %v2429_v13, %v2335_v31  ;;  %v2431_v33 = vpop.f32.mrb[53].mxu1 }
0x191c   :  { %v2432_v30 = vadd.f32 %v2431_v33, %v2339_v32  ;;  %v2433_v34 = vpop.f32.mrb[54].mxu1 }
0x191d   :  { %v2477_v19 = vmax.f32 %v2430_v22, 0.0  ;;  %v2434_v20 = vpop.f32.mrb[55].mxu1 }
0x191e   :  { %v2478_v63 = vmax.f32 %v2432_v30, 0.0 }
0x191f   :  { %v2545_v7 = vpack.c.bf16 %v2477_v19, %v2477_v19 }
0x1920   :  { %v2546_v60 = vpack.c.bf16 %v2478_v63, %v2478_v63 }
0x1922   :  { %v2470_v36 = vpop.f32.mrb[56].mxu1  ;;  %2780 = vmatprep.mubr.bf16.mxu1 %v2546_v60 }
0x1923   :  { %v2471_v38 = vadd.f32 %v2470_v36, %v2343_v35  ;;  %v2472_v40 = vpop.f32.mrb[57].mxu1  ;;  %2781 = vmatmul.mubr.bf16.vlgmr.msra.gmra.mrb[60].mxu1 %v2545_v7 }
0x1924   :  { %v2473_v37 = vadd.f32 %v2472_v40, %v2347_v2  ;;  %v2474_v39 = vpop.f32.mrb[58].mxu1 }
0x1925   :  { %v2479_v41 = vmax.f32 %v2471_v38, 0.0  ;;  %v2475_v42 = vpop.f32.mrb[59].mxu1 }
0x1926   :  { %v2480_v43 = vmax.f32 %v2473_v37, 0.0 }
0x1927   :  { %v2547_v45 = vpack.c.bf16 %v2479_v41, %v2479_v41 }
0x1928   :  { %v2548_v44 = vpack.c.bf16 %v2480_v43, %v2480_v43 }
0x192a   :  { %2820 = vmatprep.mubr.bf16.mxu0 %v2548_v44 }
0x192b   :  { %2821 = vmatmul.mubr.bf16.vlgmr.msra.gmra.mrb[56].mxu0 %v2547_v45 }
0x19f6   :  { %v3231_v47 = vpop.f32.mrb[60].mxu1 }
0x19f7   :  { %v3232_v46 = vpop.f32.mrb[61].mxu1 }
0x19f8   :  { %v3233_v48 = vadd.f32 %v3232_v46, %v3231_v47  ;;  %v3234_v49 = vpop.f32.mrb[62].mxu1 }
0x19f9   :  { %v3235_v50 = vpop.f32.mrb[63].mxu1 }
0x19fa   :  { %v2783_v54 = vadd.f32 %v3233_v48, %v3027_v51 }
0x19fe   :  { %v3253_v52 = vpop.f32.mrb[56].mxu0 }
0x19ff   :  { %v3254_v53 = vpop.f32.mrb[57].mxu0 }
0x1a00   :  { %v3255_v55 = vadd.f32 %v3254_v53, %v3253_v52  ;;  %v3256_v56 = vpop.f32.mrb[58].mxu0 }
0x1a01   :  { %v3257_v57 = vpop.f32.mrb[59].mxu0 }
0x1a02   :  { %v2823_v58 = vadd.f32 %v3255_v55, %v2783_v54 }
0x1a04   :  { %2829 = vst.msk [vmem:[#allocation2] sm:$0x3] %vm2828_vm8, %v2823_v58 }
0x1a05   :  { %3685 = shalt.err (!%p3682_p4)
}
0x1a06   :  { %s3686_s9 = scalar_lea.hbm %s4588_s23, 32 }
0x1a07   :  { %p3687_p5 = scmp.ne.s32.totalorder %s4588_s23, %s3686_s9  ;;  %p3690_p6 = scmp.lt.u32.totalorder %s3686_s9, %s4588_s23 }
0x1a09   :  { %p3692_p7 = pnand %p3690_p6, %p3687_p5 }
0x1a0b   :  { %3695 = shalt.err (!%p3692_p7)
}
0x1a0c   :  { %2839 = dma.vmem_to_hbm [thread:$0]  %s2837_s13, 32, %s4588_s23, [#allocation3]  }
0x1a0d   :  { %3696 = dma.done.wait [#allocation3], 32  }
0x1a0e   :  { %3697 = vsyncadd [#allocation3], 4294967264 }
0x1a0f   :  { %2843 = vsyncpa [#allocation3], 1 }

</bundles_post_ra>
